<compile_context>
chip_gen: v7x
topology: tpu7x:2x2x1
jax: 0.10.0
libtpu: 0.0.40
codegen_flags: <defaults>
</compile_context>

<pallas_src>
import jax
import jax.numpy as jnp
from jax import lax
from jax.experimental import pallas as pl
from jax.experimental.pallas import tpu as pltpu

EPS = 1e-5


def _bn_kernel(x_ref, w_ref, b_ref, o_ref):
    # x_ref: (N, tile_c, HW) in the model's native dtype
    # w_ref, b_ref: (1, tile_c, 1) float32
    x = x_ref[...].astype(jnp.float32)
    n, _, hw = x.shape
    inv_L = 1.0 / (n * hw)

    # Fused single pass over the tile: per-channel sum and sum of squares.
    s = jnp.sum(x, axis=(0, 2), keepdims=True)          # (1, tile_c, 1)
    sq = jnp.sum(x * x, axis=(0, 2), keepdims=True)     # (1, tile_c, 1)

    mean = s * inv_L
    # Biased variance (PyTorch normalizes with biased var in training mode).
    # Clamp to >= 0 for numerical safety of the E[x^2] - mean^2 form.
    var = jnp.maximum(sq * inv_L - mean * mean, 0.0)
    inv_std = lax.rsqrt(var + EPS)

    # Fold normalization + affine into one per-channel scale/shift so the hot
    # elementwise pass is a single mul + add per element.
    scale = w_ref[...] * inv_std                         # (1, tile_c, 1)
    shift = b_ref[...] - mean * scale                    # (1, tile_c, 1)

    o_ref[...] = (x * scale + shift).astype(o_ref.dtype)


def batchnorm2d(x_nchw, weight, bias):
    """BatchNorm2d forward using per-channel batch statistics (training mode)."""
    N, C, H, W = x_nchw.shape
    HW = H * W

    # Free reshape (no data movement) for any N: channels stay on sublanes,
    # spatial on lanes, batch as the outer block dim.
    x_3d = x_nchw.reshape(N, C, HW)
    w_3d = weight.reshape(1, C, 1).astype(jnp.float32)
    b_3d = bias.reshape(1, C, 1).astype(jnp.float32)

    # Channel tiling: 128-channel blocks (sublane-quantum aligned); C=256 ->
    # 2 parallel grid steps (double-buffered pipelining, 2-TC sharding on v7x).
    tile_c = 128 if C % 128 == 0 else (8 if C % 8 == 0 else C)

    # VMEM guard: the block spans the whole reduction axis, so shrink the
    # channel tile if the in+out double-buffered (N, tile_c, HW) blocks would
    # overflow a conservative scoped-VMEM budget (safe on v5e/v6e/v7x defaults).
    itemsize = jnp.dtype(x_3d.dtype).itemsize
    budget = 12 * 1024 * 1024
    while (tile_c > 8
           and 4 * N * tile_c * HW * itemsize > budget
           and tile_c % 16 == 0
           and C % (tile_c // 2) == 0):
        tile_c //= 2
    # TODO(synk): for very large N*H*W (e.g. N=32 @ 56x56) add an inner
    # reduction tile over H*W (grid axis "arbitrary" + (tile_c, 1) accumulator
    # scratch) instead of only shrinking the channel tile.

    grid = (C // tile_c,)

    out_3d = pl.pallas_call(
        _bn_kernel,
        out_shape=jax.ShapeDtypeStruct((N, C, HW), x_3d.dtype),
        grid=grid,
        in_specs=[
            pl.BlockSpec((N, tile_c, HW), lambda i: (0, i, 0)),
            pl.BlockSpec((1, tile_c, 1), lambda i: (0, i, 0)),
            pl.BlockSpec((1, tile_c, 1), lambda i: (0, i, 0)),
        ],
        out_specs=pl.BlockSpec((N, tile_c, HW), lambda i: (0, i, 0)),
        compiler_params=pltpu.CompilerParams(
            dimension_semantics=("parallel",),
        ),
    )(x_3d, w_3d, b_3d)

    # (N, C, H*W) -> (N, C, H, W): free reshape back.
    return out_3d.reshape(N, C, H, W)


if __name__ == "__main__":
    key = jax.random.PRNGKey(0)
    kx, kw, kb = jax.random.split(key, 3)

    # Shapes implied by the module: BatchNorm2d(256) on a [1, 256, 28, 28] input.
    N, C, H, W = 1, 256, 28, 28
    x = jax.random.normal(kx, (N, C, H, W), dtype=jnp.float32)
    # Non-trivial affine parameters to exercise the affine path
    # (PyTorch defaults would be weight=1, bias=0).
    weight = 1.0 + 0.1 * jax.random.normal(kw, (C,), dtype=jnp.float32)
    bias = 0.1 * jax.random.normal(kb, (C,), dtype=jnp.float32)

    out = batchnorm2d(x, weight, bias)
    out = jax.block_until_ready(out)

    # Pure-JAX reference (training-mode batchnorm, biased variance).
    mean = jnp.mean(x, axis=(0, 2, 3), keepdims=True)
    var = jnp.mean((x - mean) ** 2, axis=(0, 2, 3), keepdims=True)
    ref = (x - mean) / jnp.sqrt(var + EPS) * weight.reshape(1, C, 1, 1) + bias.reshape(1, C, 1, 1)
    assert jnp.max(jnp.abs(out - ref)) < 1e-4, "mismatch vs reference"

    # TODO(synk): PyTorch training-mode BatchNorm2d also updates
    # running_mean/running_var; only the normalized forward output is produced.

    print("KERNEL_OK")
</pallas_src>

<mosaic_0001>
module attributes {stable_mosaic.version = 11 : i64} {
  func.func @_bn_kernel(%arg0: i32, %arg1: memref<1x128x784xf32, #tpu.memory_space<vmem>>, %arg2: memref<1x128x1xf32, #tpu.memory_space<vmem>>, %arg3: memref<1x128x1xf32, #tpu.memory_space<vmem>>, %arg4: memref<1x128x784xf32, #tpu.memory_space<vmem>>) attributes {dimension_semantics = [#tpu.dimension_semantics<parallel>], iteration_bounds = array<i64: 2>, scalar_prefetch = 0 : i64, scratch_operands = 0 : i64, tpu.core_type = #tpu.core_type<tc>, window_params = [{transform_indices = @transform_0, window_bounds = array<i64: 1, 128, 784>}, {transform_indices = @transform_1, window_bounds = array<i64: 1, 128, 1>}, {transform_indices = @transform_2, window_bounds = array<i64: 1, 128, 1>}, {transform_indices = @transform_3, window_bounds = array<i64: 1, 128, 784>}]} {
    %c0 = arith.constant 0 : index
    %c0_0 = arith.constant 0 : index
    %c0_1 = arith.constant 0 : index
    %0 = vector.load %arg1[%c0, %c0_0, %c0_1] : memref<1x128x784xf32, #tpu.memory_space<vmem>>, vector<1x128x784xf32>
    %cst = arith.constant dense<0.000000e+00> : vector<128xf32>
    %1 = vector.multi_reduction <add>, %0, %cst [0, 2] : vector<1x128x784xf32> to vector<128xf32>
    %2 = vector.shape_cast %1 : vector<128xf32> to vector<1x128x1xf32>
    %3 = arith.mulf %0, %0 : vector<1x128x784xf32>
    %cst_2 = arith.constant dense<0.000000e+00> : vector<128xf32>
    %4 = vector.multi_reduction <add>, %3, %cst_2 [0, 2] : vector<1x128x784xf32> to vector<128xf32>
    %5 = vector.shape_cast %4 : vector<128xf32> to vector<1x128x1xf32>
    %cst_3 = arith.constant 0.00127551018 : f32
    %6 = vector.broadcast %cst_3 : f32 to vector<1x128x1xf32>
    %7 = arith.mulf %2, %6 : vector<1x128x1xf32>
    %cst_4 = arith.constant 0.00127551018 : f32
    %8 = vector.broadcast %cst_4 : f32 to vector<1x128x1xf32>
    %9 = arith.mulf %5, %8 : vector<1x128x1xf32>
    %10 = arith.mulf %7, %7 : vector<1x128x1xf32>
    %11 = arith.subf %9, %10 : vector<1x128x1xf32>
    %cst_5 = arith.constant 0.000000e+00 : f32
    %12 = vector.broadcast %cst_5 : f32 to vector<1x128x1xf32>
    %13 = arith.maximumf %11, %12 : vector<1x128x1xf32>
    %cst_6 = arith.constant 9.99999974E-6 : f32
    %14 = vector.broadcast %cst_6 : f32 to vector<1x128x1xf32>
    %15 = arith.addf %13, %14 : vector<1x128x1xf32>
    %16 = math.rsqrt %15 : vector<1x128x1xf32>
    %c0_7 = arith.constant 0 : index
    %c0_8 = arith.constant 0 : index
    %c0_9 = arith.constant 0 : index
    %17 = vector.load %arg2[%c0_7, %c0_8, %c0_9] : memref<1x128x1xf32, #tpu.memory_space<vmem>>, vector<1x128x1xf32>
    %18 = arith.mulf %17, %16 : vector<1x128x1xf32>
    %c0_10 = arith.constant 0 : index
    %c0_11 = arith.constant 0 : index
    %c0_12 = arith.constant 0 : index
    %19 = vector.load %arg3[%c0_10, %c0_11, %c0_12] : memref<1x128x1xf32, #tpu.memory_space<vmem>>, vector<1x128x1xf32>
    %20 = arith.mulf %7, %18 : vector<1x128x1xf32>
    %21 = arith.subf %19, %20 : vector<1x128x1xf32>
    %22 = vector.broadcast %18 : vector<1x128x1xf32> to vector<1x128x784xf32>
    %23 = arith.mulf %0, %22 : vector<1x128x784xf32>
    %24 = vector.broadcast %21 : vector<1x128x1xf32> to vector<1x128x784xf32>
    %25 = arith.addf %23, %24 : vector<1x128x784xf32>
    %c0_13 = arith.constant 0 : index
    %c0_14 = arith.constant 0 : index
    %c0_15 = arith.constant 0 : index
    %26 = vector.load %arg4[%c0_13, %c0_14, %c0_15] : memref<1x128x784xf32, #tpu.memory_space<vmem>>, vector<1x128x784xf32>
    tpu.vector_store %arg4[%c0_13, %c0_14, %c0_15], %25 {strides = array<i32>} : memref<1x128x784xf32, #tpu.memory_space<vmem>>, vector<1x128x784xf32>,
    return
  }
  func.func @transform_0(%arg0: i32) -> (i32, i32, i32) {
    %c0_i32 = arith.constant 0 : i32
    %c0_i32_0 = arith.constant 0 : i32
    %c0_i32_1 = arith.constant 0 : i32
    return %c0_i32, %arg0, %c0_i32_0 : i32, i32, i32
  }
  func.func @transform_1(%arg0: i32) -> (i32, i32, i32) {
    %c0_i32 = arith.constant 0 : i32
    %c0_i32_0 = arith.constant 0 : i32
    %c0_i32_1 = arith.constant 0 : i32
    return %c0_i32, %arg0, %c0_i32_0 : i32, i32, i32
  }
  func.func @transform_2(%arg0: i32) -> (i32, i32, i32) {
    %c0_i32 = arith.constant 0 : i32
    %c0_i32_0 = arith.constant 0 : i32
    %c0_i32_1 = arith.constant 0 : i32
    return %c0_i32, %arg0, %c0_i32_0 : i32, i32, i32
  }
  func.func @transform_3(%arg0: i32) -> (i32, i32, i32) {
    %c0_i32 = arith.constant 0 : i32
    %c0_i32_0 = arith.constant 0 : i32
    %c0_i32_1 = arith.constant 0 : i32
    return %c0_i32, %arg0, %c0_i32_0 : i32, i32, i32
  }
}

</mosaic_0001>

<bundles_post_ra>
// kernel: tpu_custom_call.1
= control target key start
LH: loop header
LB: loop body
LE: loop exit
PB: predicated region body
PF: predicated region fallthrough
CT: control target
= control target key end

     0   :  { %s1706_s12 = smov 0   ;;  %s3243_s0 = inlined_call_operand.vmem [shape: f32[1,256,784], index: 0, kind: input, shape index: {}]   ;;  %s3244_s1 = inlined_call_operand.vmem [shape: f32[1,256,1], index: 1, kind: input, shape index: {}]   ;;  %s3245_s2 = inlined_call_operand.vmem [shape: f32[1,256,1], index: 2, kind: input, shape index: {}]   ;;  %s3246_s3 = inlined_call_operand.vmem [shape: f32[1,256,784], index: 3, kind: output, shape index: {}]  }
   0x1 LB: > { %s1506_s13 = sadd.s32 4294967295, %s1683_s12   ;;  %p1510_p0 = scmp.ge.s32.totalorder %s1683_s12, 1  ;;  %s1683_s12 = sphi %s1706_s12, %s13_s12  }
   0x2   : > { %p161_p1 = scmp.lt.s32.totalorder %s1683_s12, 3 }
   0x4   : > { %p162_p2 = pnand %p1510_p0, %p161_p1 }
   0x6   : > { %165 = sbr.rel (%p162_p2) target bundleno = 469 (0x1d5), region = 32 }
   0xd   : > { %s1511_s14 = sshll.u32 %s1506_s13, 4  ;;  %vm340_vm0 = vcmask 130048  }
   0xe   : > { %p198_p3 = scmp.lt.s32.totalorder %s1511_s14, 31 }
  0x10   : > { %s3461_s14 = smov (!%p198_p3, %s1511_s14), 31 }
  0x11   : > { %s1521_s15 = smul.u32 56, %s3461_s14  ;;  %s1514_s19 = sshll.u32 %s3461_s14, 3 }
  0x12   : > { %s2414_s22 = scalar_lea.vmem %s3244_s1, %s1514_s19  ;;  %s2508_s25 = scalar_lea.vmem %s3245_s2, %s1514_s19 }
  0x13   : > { %s1722_s18 = scalar_lea.vmem %s3243_s0, %s1521_s15  ;;  %s2900_s28 = scalar_lea.vmem %s3246_s3, %s1521_s15 }
  0x14   : > { %v237_v0 = vld [vmem:[%s1722_s18 + $0x70] sm:$0xff]  ;;  %v238_v1 = vld [vmem:[%s1722_s18 + $0x78] sm:$0xff]  ;;  %v239_v2 = vld [vmem:[%s1722_s18 + $0x80] sm:$0xff] }
  0x15   : > { %v240_v3 = vld [vmem:[%s1722_s18 + $0x88] sm:$0xff]  ;;  %v354_v4 = vadd.f32 %v238_v1, %v237_v0  ;;  %v1729_v5 = vld [vmem:[%s1722_s18 + $0xa0] sm:$0xff]  ;;  %v1733_v8 = vmul.f32 %v237_v0, %v237_v0  ;;  %v1735_v9 = vmul.f32 %v238_v1, %v238_v1  ;;  %v241_v10 = vld [vmem:[%s1722_s18 + $0x90] sm:$0xff]  ;;  %v1740_v15 = vmul.f32 %v239_v2, %v239_v2 }
  0x16   : > { %v223_v6 = vld [vmem:[%s1722_s18] sm:$0xff]  ;;  %v224_v7 = vld [vmem:[%s1722_s18 + $0x8] sm:$0xff]  ;;  %v242_v11 = vld [vmem:[%s1722_s18 + $0x98] sm:$0xff]  ;;  %v1742_v16 = vmul.f32 %v240_v3, %v240_v3  ;;  %v1747_v22 = vmul.f32 %v241_v10, %v241_v10  ;;  %v359_v25 = vsel %vm340_vm0, %v1729_v5, 0.0 }
  0x17   : > { %v355_v12 = vadd.f32 %v354_v4, %v239_v2  ;;  %v225_v13 = vld [vmem:[%s1722_s18 + $0x10] sm:$0xff]  ;;  %v335_v14 = vadd.f32 %v224_v7, %v223_v6  ;;  %v226_v17 = vld [vmem:[%s1722_s18 + $0x18] sm:$0xff]  ;;  %v244_v19 = vld [vmem:[%s1722_s18 + $0xa8] sm:$0xff]  ;;  %v480_v20 = vmul.f32 %v223_v6, %v223_v6  ;;  %v481_v21 = vmul.f32 %v224_v7, %v224_v7 }
  0x18   : > { %v229_v18 = vld [vmem:[%s1722_s18 + $0x30] sm:$0xff]  ;;  %v1749_v23 = vmul.f32 %v242_v11, %v242_v11  ;;  %v227_v26 = vld [vmem:[%s1722_s18 + $0x20] sm:$0xff]  ;;  %v1758_v29 = vld [vmem:[%s1722_s18 + $0xb8] sm:$0xff]  ;;  %v1760_v30 = vmul.f32 %v225_v13, %v225_v13  ;;  %v1771_v36 = vmul.f32 %v226_v17, %v226_v17  ;;  %v1787_v50 = vmul.f32 %v244_v19, %v244_v19 }
  0x19   : > { %v356_v24 = vadd.f32 %v355_v12, %v240_v3  ;;  %v336_v27 = vadd.f32 %v335_v14, %v225_v13  ;;  %v1755_v28 = vld [vmem:[%s1722_s18 + $0xb0] sm:$0xff]  ;;  %v228_v31 = vld [vmem:[%s1722_s18 + $0x28] sm:$0xff]  ;;  %v341_v32 = vsel %vm340_vm0, %v229_v18, 0.0  ;;  %v1765_v33 = vld [vmem:[%s1722_s18 + $0xc0] sm:$0xff]  ;;  %v1773_v37 = vmul.f32 %v227_v26, %v227_v26 }
  0x1a   : > { %v1768_v34 = vld [vmem:[%s1722_s18 + $0xd8] sm:$0xff]  ;;  %v363_v35 = vadd.f32 %v1755_v28, %v244_v19  ;;  %v231_v41 = vld [vmem:[%s1722_s18 + $0x40] sm:$0xff]  ;;  %v232_v42 = vld [vmem:[%s1722_s18 + $0x48] sm:$0xff]  ;;  %v1778_v43 = vmul.f32 %v228_v31, %v228_v31  ;;  %v1780_v44 = vmul.f32 %v229_v18, %v229_v18  ;;  %v592_v49 = vadd.f32 %v481_v21, %v480_v20 }
  0x1b   : > { %v357_v38 = vadd.f32 %v356_v24, %v241_v10  ;;  %v337_v39 = vadd.f32 %v336_v27, %v226_v17  ;;  %v230_v40 = vld [vmem:[%s1722_s18 + $0x38] sm:$0xff]  ;;  %v1783_v45 = vld [vmem:[%s1722_s18 + $0xc8] sm:$0xff]  ;;  %v233_v47 = vld [vmem:[%s1722_s18 + $0x50] sm:$0xff]  ;;  %v488_v57 = vmul.f32 %v231_v41, %v231_v41  ;;  %v368_v60 = vsel %vm340_vm0, %v1768_v34, 0.0 }
  0x1c   : > { %v364_v46 = vadd.f32 %v363_v35, %v1758_v29  ;;  %v345_v48 = vadd.f32 %v231_v41, %v230_v40  ;;  %v236_v53 = vld [vmem:[%s1722_s18 + $0x68] sm:$0xff]  ;;  %v1791_v54 = vld [vmem:[%s1722_s18 + $0x118] sm:$0xff]  ;;  %v1794_v55 = vld [vmem:[%s1722_s18 + $0x120] sm:$0xff]  ;;  %v487_v56 = vmul.f32 %v230_v40, %v230_v40  ;;  %v489_v6 = vmul.f32 %v232_v42, %v232_v42 }
  0x1d   : > { %v358_v51 = vadd.f32 %v357_v38, %v242_v11  ;;  %v338_v52 = vadd.f32 %v337_v39, %v227_v26  ;;  %v1797_v58 = vld [vmem:[%s1722_s18 + $0xd0] sm:$0xff]  ;;  %v1803_v62 = vld [vmem:[%s1722_s18 + $0x128] sm:$0xff]  ;;  %v381_v63 = vadd.f32 %v1794_v55, %v1791_v54  ;;  %v234_v2 = vld [vmem:[%s1722_s18 + $0x58] sm:$0xff]  ;;  %v490_v7 = vmul.f32 %v233_v47, %v233_v47 }
  0x1e   : > { %v365_v59 = vadd.f32 %v364_v46, %v1765_v33  ;;  %v346_v61 = vadd.f32 %v345_v48, %v232_v42  ;;  %v1809_v3 = vld [vmem:[%s1722_s18 + $0x130] sm:$0xff]  ;;  %v1812_v4 = vld [vmem:[%s1722_s18 + $0xe0] sm:$0xff]  ;;  %v350_v12 = vsel %vm340_vm0, %v236_v53, 0.0  ;;  %v1817_v13 = vld [vmem:[%s1722_s18 + $0x148] sm:$0xff]  ;;  %v491_v26 = vmul.f32 %v234_v2, %v234_v2 }
  0x1f   : > { %v360_v0 = vadd.f32 %v359_v25, %v358_v51  ;;  %v339_v1 = vadd.f32 %v338_v52, %v228_v31  ;;  %v382_v14 = vadd.f32 %v381_v63, %v1803_v62  ;;  %v1821_v17 = vld [vmem:[%s1722_s18 + $0xe8] sm:$0xff]  ;;  %v1824_v18 = vld [vmem:[%s1722_s18 + $0xf0] sm:$0xff]  ;;  %v235_v20 = vld [vmem:[%s1722_s18 + $0x60] sm:$0xff]  ;;  %v601_v27 = vadd.f32 %v488_v57, %v487_v56 }
  0x20   : > { %v366_v10 = vadd.f32 %v365_v59, %v1783_v45  ;;  %v347_v11 = vadd.f32 %v346_v61, %v233_v47  ;;  %v1828_v21 = vld [vmem:[%s1722_s18 + $0x138] sm:$0xff]  ;;  %v372_v25 = vadd.f32 %v1821_v17, %v1812_v4  ;;  %v1838_v39 = vld [vmem:[%s1722_s18 + $0x188] sm:$0xff]  ;;  %v1846_v41 = vmul.f32 %v235_v20, %v235_v20  ;;  %v1849_v42 = vld [vmem:[%s1722_s18 + $0x140] sm:$0xff] }
  0x21   : > { %361 = vadd.xlane.f32.xlu1 %v360_v0  ;;  %v342_v19 = vadd.f32 %v341_v32, %v339_v1  ;;  %v1831_v24 = vld [vmem:[%s1722_s18 + $0xf8] sm:$0xff]  ;;  %v383_v38 = vadd.f32 %v382_v14, %v1809_v3  ;;  %v1841_v32 = vld [vmem:[%s1722_s18 + $0x190] sm:$0xff]  ;;  %v386_v46 = vsel %vm340_vm0, %v1817_v13, 0.0  ;;  %v1854_v47 = vld [vmem:[%s1722_s18 + $0x100] sm:$0xff]  ;;  %v602_v56 = vadd.f32 %v601_v27, %v489_v6 }
  0x22   : > { %v367_v31 = vadd.f32 %v366_v10, %v1797_v58  ;;  %v348_v35 = vadd.f32 %v347_v11, %v234_v2  ;;  %v1844_v40 = vld [vmem:[%s1722_s18 + $0x198] sm:$0xff]  ;;  %v1857_v48 = vld [vmem:[%s1722_s18 + $0x110] sm:$0xff]  ;;  %v373_v51 = vadd.f32 %v372_v25, %v1824_v18  ;;  %v399_v52 = vadd.f32 %v1841_v32, %v1838_v39  ;;  %v1864_v63 = vld [vmem:[%s1722_s18 + $0x1a0] sm:$0xff] }
  0x23   : > { %343 = vadd.xlane.f32.xlu0 %v342_v19  ;;  %v384_v61 = vadd.f32 %v383_v38, %v1828_v21  ;;  %v1867_v0 = vld [vmem:[%s1722_s18 + $0x150] sm:$0xff]  ;;  %v1870_v1 = vld [vmem:[%s1722_s18 + $0x158] sm:$0xff]  ;;  %v593_v2 = vadd.f32 %v592_v49, %v1760_v30  ;;  %v1874_v10 = vld [vmem:[%s1722_s18 + $0x108] sm:$0xff] }
  0x24   : > { %v369_v57 = vadd.f32 %v368_v60, %v367_v31  ;;  %v349_v59 = vadd.f32 %v348_v35, %v235_v20  ;;  %3292 = vst [vmem:[#allocation2_spill] sm:$0xff] %v1867_v0  ;;  %3293 = vst [vmem:[#allocation3_spill] sm:$0xff] %v1870_v1  ;;  %v374_v11 = vadd.f32 %v373_v51, %v1831_v24  ;;  %v1878_v6 = vld [vmem:[%s1722_s18 + $0x1a8] sm:$0xff]  ;;  %v1882_v14 = vld [vmem:[%s1722_s18 + $0x160] sm:$0xff] }
  0x25   : > { %3294 = vst [vmem:[#allocation4_spill] sm:$0xff] %v1878_v6  ;;  %v400_v60 = vadd.f32 %v399_v52, %v1844_v40  ;;  %3295 = vst [vmem:[#allocation5_spill] sm:$0xff] %v1882_v14  ;;  %v390_v19 = vadd.f32 %v1870_v1, %v1867_v0  ;;  %v493_v20 = vmul.f32 %v236_v53, %v236_v53  ;;  %v1888_v49 = vld [vmem:[%s1722_s18 + $0x1b8] sm:$0xff]  ;;  %v1891_v27 = vld [vmem:[%s1722_s18 + $0x168] sm:$0xff]  ;;  %v377_v53 = vsel %vm340_vm0, %v1857_v48, 0.0 }
  0x26   : > { %370 = vadd.xlane.f32.xlu1 %v369_v57  ;;  %v351_v25 = vadd.f32 %v350_v12, %v349_v59  ;;  %v385_v30 = vadd.f32 %v384_v61, %v1849_v42  ;;  %3296 = vst [vmem:[#allocation6_spill] sm:$0xff] %v1888_v49  ;;  %3297 = vst [vmem:[#allocation7_spill] sm:$0xff] %v1891_v27  ;;  %v1894_v31 = vld [vmem:[%s1722_s18 + $0x1f8] sm:$0xff]  ;;  %v603_v35 = vadd.f32 %v602_v56, %v490_v7  ;;  %v1902_v52 = vld [vmem:[%s1722_s18 + $0x180] sm:$0xff] }
  0x27   : > { %3298 = vst [vmem:[#allocation8_spill] sm:$0xff] %v1894_v31  ;;  %v594_v38 = vadd.f32 %v593_v2, %v1771_v36  ;;  %v375_v51 = vadd.f32 %v374_v11, %v1854_v47  ;;  %v401_v12 = vadd.f32 %v400_v60, %v1864_v63  ;;  %3299 = vst [vmem:[#allocation9_spill] sm:$0xff] %v1902_v52  ;;  %v1906_v59 = vld [vmem:[%s1722_s18 + $0x200] sm:$0xff]  ;;  %v1909_v61 = vld [vmem:[%s1722_s18 + $0x208] sm:$0xff] }
  0x28   : > { %v391_v57 = vadd.f32 %v390_v19, %v1882_v14  ;;  %3300 = vst [vmem:[#allocation10_spill] sm:$0xff] %v1906_v59  ;;  %352 = vadd.xlane.f32.xlu0 %v351_v25  ;;  %v387_v36 = vadd.f32 %v386_v46, %v385_v30  ;;  %v1912_v7 = vld [vmem:[%s1722_s18 + $0x1b0] sm:$0xff]  ;;  %v417_v11 = vadd.f32 %v1906_v59, %v1894_v31  ;;  %v1927_v30 = vld [vmem:[%s1722_s18 + $0x1c0] sm:$0xff]  ;;  %v1930_v1 = vld [vmem:[%s1722_s18 + $0x1c8] sm:$0xff] }
  0x29   : > { %v1915_v56 = vld [vmem:[%s1722_s18 + $0x170] sm:$0xff]  ;;  %v604_v60 = vadd.f32 %v603_v35, %v491_v26  ;;  %v595_v19 = vadd.f32 %v594_v38, %v1773_v37  ;;  %v376_v14 = vadd.f32 %v375_v51, %v1874_v10  ;;  %v402_v25 = vadd.f32 %v401_v12, %v1878_v6  ;;  %3303 = vst [vmem:[#allocation13_spill] sm:$0xff] %v1927_v30  ;;  %v1939_v35 = vld [vmem:[%s1722_s18 + $0x178] sm:$0xff]  ;;  %v1947_v12 = vld [vmem:[%s1722_s18 + $0x228] sm:$0xff] }
  0x2a   : > { %3301 = vst [vmem:[#allocation11_spill] sm:$0xff] %v1915_v56  ;;  %v1918_v2 = vld [vmem:[%s1722_s18 + $0x210] sm:$0xff]  ;;  %v392_v46 = vadd.f32 %v391_v57, %v1891_v27  ;;  %3304 = vst [vmem:[#allocation14_spill] sm:$0xff] %v1930_v1  ;;  %v606_v26 = vsel %vm340_vm0, %v493_v20, 0.0  ;;  %388 = vadd.xlane.f32.xlu1 %v387_v36  ;;  %v404_v37 = vsel %vm340_vm0, %v1888_v49, 0.0  ;;  %v395_v38 = vsel %vm340_vm0, %v1902_v52, 0.0 }
  0x2b   : > { %3302 = vst [vmem:[#allocation12_spill] sm:$0xff] %v1918_v2  ;;  %v1933_v0 = vld [vmem:[%s1722_s18 + $0x1d0] sm:$0xff]  ;;  %3306 = vst [vmem:[#allocation16_spill] sm:$0xff] %v1939_v35  ;;  %v1944_v51 = vld [vmem:[%s1722_s18 + $0x218] sm:$0xff]  ;;  %v418_v57 = vadd.f32 %v417_v11, %v1909_v61  ;;  %v408_v20 = vadd.f32 %v1930_v1, %v1927_v30  ;;  %v378_v36 = vadd.f32 %v377_v53, %v376_v14 }
  0x2c   : > { %3305 = vst [vmem:[#allocation15_spill] sm:$0xff] %v1933_v0  ;;  %3307 = vst [vmem:[#allocation17_spill] sm:$0xff] %v1944_v51  ;;  %v403_v59 = vadd.f32 %v402_v25, %v1912_v7  ;;  %v393_v31 = vadd.f32 %v392_v46, %v1915_v56  ;;  %v1955_v27 = vld [vmem:[%s1722_s18 + $0x220] sm:$0xff]  ;;  %v1958_v52 = vld [vmem:[%s1722_s18 + $0x1d8] sm:$0xff]  ;;  %v605_v11 = vadd.f32 %v604_v60, %v1846_v41 }
  0x2d   : > { %3308 = vst [vmem:[#allocation18_spill] sm:$0xff] %v1947_v12  ;;  %3309 = vst [vmem:[#allocation19_spill] sm:$0xff] %v1958_v52  ;;  %v1961_v6 = vld [vmem:[%s1722_s18 + $0x268] sm:$0xff]  ;;  %v1964_v49 = vld [vmem:[%s1722_s18 + $0x270] sm:$0xff]  ;;  %v419_v1 = vadd.f32 %v418_v57, %v1918_v2  ;;  %v409_v25 = vadd.f32 %v408_v20, %v1933_v0  ;;  %v596_v56 = vadd.f32 %v595_v19, %v1778_v43  ;;  %379 = vadd.xlane.f32.xlu0 %v378_v36 }
  0x2e   : > { %3310 = vst [vmem:[#allocation20_spill] sm:$0xff] %v1961_v6  ;;  %3311 = vst [vmem:[#allocation21_spill] sm:$0xff] %v1964_v49  ;;  %v1969_v14 = vld [vmem:[%s1722_s18 + $0x1e0] sm:$0xff]  ;;  %v1972_v53 = vld [vmem:[%s1722_s18 + $0x1f0] sm:$0xff]  ;;  %v435_v30 = vadd.f32 %v1964_v49, %v1961_v6  ;;  %v405_v41 = vadd.f32 %v404_v37, %v403_v59  ;;  %v394_v60 = vadd.f32 %v393_v31, %v1939_v35  ;;  %v597_v0 = vsel %vm340_vm0, %v1780_v44, 0.0 }
  0x2f   : > { %3312 = vst [vmem:[#allocation22_spill] sm:$0xff] %v1972_v53  ;;  %v1976_v46 = vld [vmem:[%s1722_s18 + $0x278] sm:$0xff]  ;;  %v1983_v57 = vld [vmem:[%s1722_s18 + $0x1e8] sm:$0xff]  ;;  %v1986_v2 = vld [vmem:[%s1722_s18 + $0x280] sm:$0xff]  ;;  %v502_v49 = vmul.f32 %v1755_v28, %v1755_v28  ;;  %v420_v43 = vadd.f32 %v419_v1, %v1944_v51  ;;  %v422_v31 = vsel %vm340_vm0, %v1947_v12, 0.0  ;;  %v410_v59 = vadd.f32 %v409_v25, %v1958_v52 }
  0x30   : > { %3313 = vst [vmem:[#allocation23_spill] sm:$0xff] %v1976_v46  ;;  %3314 = vst [vmem:[#allocation24_spill] sm:$0xff] %v1986_v2  ;;  %v1989_v20 = vld [vmem:[%s1722_s18 + $0x230] sm:$0xff]  ;;  %v2000_v19 = vld [vmem:[%s1722_s18 + $0x298] sm:$0xff]  ;;  %v436_v37 = vadd.f32 %v435_v30, %v1976_v46  ;;  %406 = vadd.xlane.f32.xlu1 %v405_v41  ;;  %v396_v28 = vadd.f32 %v395_v38, %v394_v60  ;;  %v413_v1 = vsel %vm340_vm0, %v1972_v53, 0.0 }
  0x31   : > { %3315 = vst [vmem:[#allocation25_spill] sm:$0xff] %v1989_v20  ;;  %3316 = vst [vmem:[#allocation26_spill] sm:$0xff] %v2000_v19  ;;  %v2004_v36 = vld [vmem:[%s1722_s18 + $0x238] sm:$0xff]  ;;  %v2007_v44 = vld [vmem:[%s1722_s18 + $0x240] sm:$0xff]  ;;  %v2022_v46 = vadd.f32 %v606_v26, %v605_v11  ;;  %v421_v51 = vadd.f32 %v420_v43, %v1955_v27  ;;  %v411_v41 = vadd.f32 %v410_v59, %v1969_v14  ;;  %v440_v11 = vsel %vm340_vm0, %v2000_v19, 0.0 }
  0x32   : > { %3317 = vst [vmem:[#allocation27_spill] sm:$0xff] %v2004_v36  ;;  %3318 = vst [vmem:[#allocation28_spill] sm:$0xff] %v2007_v44  ;;  %v2012_v6 = vld [vmem:[%s1722_s18 + $0x288] sm:$0xff]  ;;  %v2018_v52 = vld [vmem:[%s1722_s18 + $0x260] sm:$0xff]  ;;  %v426_v30 = vadd.f32 %v2004_v36, %v1989_v20  ;;  %v437_v38 = vadd.f32 %v436_v37, %v1986_v2  ;;  %v2036_v35 = vadd.f32 %v597_v0, %v596_v56  ;;  %397 = vadd.xlane.f32.xlu0 %v396_v28 }
  0x33   : > { %v2015_v25 = vld [vmem:[%s1722_s18 + $0x248] sm:$0xff]  ;;  %3320 = vst [vmem:[#allocation30_spill] sm:$0xff] %v2018_v52  ;;  %v2028_v60 = vld [vmem:[%s1722_s18 + $0x2d8] sm:$0xff]  ;;  %v2031_v53 = vld [vmem:[%s1722_s18 + $0x2e0] sm:$0xff]  ;;  %v503_v36 = vmul.f32 %v1758_v29, %v1758_v29  ;;  %v423_v0 = vadd.f32 %v422_v31, %v421_v51  ;;  %v412_v56 = vadd.f32 %v411_v41, %v1983_v57  ;;  %v431_v51 = vsel %vm340_vm0, %v2018_v52, 0.0 }
  0x34   : > { %3319 = vst [vmem:[#allocation29_spill] sm:$0xff] %v2015_v25  ;;  %3321 = vst [vmem:[#allocation31_spill] sm:$0xff] %v2028_v60  ;;  %v2034_v12 = vld [vmem:[%s1722_s18 + $0x2e8] sm:$0xff]  ;;  %v2039_v26 = vld [vmem:[%s1722_s18 + $0x290] sm:$0xff]  ;;  %v427_v59 = vadd.f32 %v426_v30, %v2007_v44  ;;  %v453_v37 = vadd.f32 %v2031_v53, %v2028_v60  ;;  %v438_v28 = vadd.f32 %v437_v38, %v2012_v6 }
  0x35   : > { %3322 = vst [vmem:[#allocation32_spill] sm:$0xff] %v2031_v53  ;;  %3323 = vst [vmem:[#allocation33_spill] sm:$0xff] %v2034_v12  ;;  %v2044_v43 = vld [vmem:[%s1722_s18 + $0x250] sm:$0xff]  ;;  %v2057_v19 = vld [vmem:[%s1722_s18 + $0x2a0] sm:$0xff]  ;;  %v504_v30 = vmul.f32 %v1765_v33, %v1765_v33  ;;  %424 = vadd.xlane.f32.xlu1 %v423_v0  ;;  %v414_v33 = vadd.f32 %v413_v1, %v412_v56 }
  0x36   : > { %3324 = vst [vmem:[#allocation34_spill] sm:$0xff] %v2039_v26  ;;  %3325 = vst [vmem:[#allocation35_spill] sm:$0xff] %v2044_v43  ;;  %v2054_v20 = vld [vmem:[%s1722_s18 + $0x2f0] sm:$0xff]  ;;  %v2060_v2 = vld [vmem:[%s1722_s18 + $0x2a8] sm:$0xff]  ;;  %v428_v29 = vadd.f32 %v427_v59, %v2015_v25  ;;  %v454_v41 = vadd.f32 %v453_v37, %v2034_v12  ;;  %v439_v44 = vadd.f32 %v438_v28, %v2039_v26 }
  0x37   : > { %3326 = vst [vmem:[#allocation36_spill] sm:$0xff] %v2054_v20  ;;  %3327 = vst [vmem:[#allocation37_spill] sm:$0xff] %v2057_v19  ;;  %v2065_v53 = vld [vmem:[%s1722_s18 + $0x258] sm:$0xff]  ;;  %v2075_v38 = vld [vmem:[%s1722_s18 + $0x2b0] sm:$0xff]  ;;  %v444_v60 = vadd.f32 %v2060_v2, %v2057_v19  ;;  %v505_v37 = vmul.f32 %v1783_v45, %v1783_v45  ;;  %v619_v12 = vadd.f32 %v502_v49, %v1787_v50  ;;  %415 = vadd.xlane.f32.xlu0 %v414_v33 }
  0x38   : > { %3328 = vst [vmem:[#allocation38_spill] sm:$0xff] %v2060_v2  ;;  %v2071_v31 = vld [vmem:[%s1722_s18 + $0x2f8] sm:$0xff]  ;;  %3330 = vst [vmem:[#allocation40_spill] sm:$0xff] %v2075_v38  ;;  %v2081_v59 = vld [vmem:[%s1722_s18 + $0x308] sm:$0xff]  ;;  %v429_v2 = vadd.f32 %v428_v29, %v2044_v43  ;;  %v455_v1 = vadd.f32 %v454_v41, %v2054_v20  ;;  %v507_v45 = vmul.f32 %v1768_v34, %v1768_v34 }
  0x39   : > { %3329 = vst [vmem:[#allocation39_spill] sm:$0xff] %v2071_v31  ;;  %v2084_v52 = vld [vmem:[%s1722_s18 + $0x2b8] sm:$0xff]  ;;  %v2087_v25 = vld [vmem:[%s1722_s18 + $0x348] sm:$0xff]  ;;  %v2094_v0 = vld [vmem:[%s1722_s18 + $0x300] sm:$0xff]  ;;  %v445_v56 = vadd.f32 %v444_v60, %v2075_v38  ;;  %v441_v50 = vadd.f32 %v440_v11, %v439_v44  ;;  %v506_v38 = vmul.f32 %v1797_v58, %v1797_v58  ;;  %v620_v20 = vadd.f32 %v619_v12, %v503_v36 }
  0x3a   : > { %3331 = vst [vmem:[#allocation41_spill] sm:$0xff] %v2084_v52  ;;  %3332 = vst [vmem:[#allocation42_spill] sm:$0xff] %v2087_v25  ;;  %v2099_v28 = vld [vmem:[%s1722_s18 + $0x350] sm:$0xff]  ;;  %v2102_v19 = vld [vmem:[%s1722_s18 + $0x358] sm:$0xff]  ;;  %v430_v43 = vadd.f32 %v429_v2, %v2065_v53  ;;  %v456_v34 = vadd.f32 %v455_v1, %v2071_v31  ;;  %v458_v44 = vsel %vm340_vm0, %v2081_v59, 0.0  ;;  %v610_v1 = vadd.f32 %v1735_v9, %v1733_v8 }
  0x3b   : > { %3333 = vst [vmem:[#allocation43_spill] sm:$0xff] %v2099_v28  ;;  %v2107_v49 = vld [vmem:[%s1722_s18 + $0x2c0] sm:$0xff]  ;;  %v2110_v29 = vld [vmem:[%s1722_s18 + $0x2d0] sm:$0xff]  ;;  %v471_v60 = vadd.f32 %v2099_v28, %v2087_v25  ;;  %v446_v11 = vadd.f32 %v445_v56, %v2084_v52  ;;  %v2128_v26 = vld [vmem:[%s1722_s18 + $0x318] sm:$0xff]  ;;  %442 = vadd.xlane.f32.xlu1 %v441_v50  ;;  %v621_v36 = vadd.f32 %v620_v20, %v504_v30 }
  0x3c   : > { %3334 = vst [vmem:[#allocation44_spill] sm:$0xff] %v2110_v29  ;;  %v2113_v41 = vld [vmem:[%s1722_s18 + $0x360] sm:$0xff]  ;;  %v2125_v33 = vld [vmem:[%s1722_s18 + $0x310] sm:$0xff]  ;;  %3336 = vst [vmem:[#allocation46_spill] sm:$0xff] %v2128_v26  ;;  %v432_v56 = vadd.f32 %v431_v51, %v430_v43  ;;  %v457_v25 = vadd.f32 %v456_v34, %v2094_v0  ;;  %v449_v20 = vsel %vm340_vm0, %v2110_v29, 0.0  ;;  %v515_v29 = vmul.f32 %v1791_v54, %v1791_v54 }
  0x3d   : > { %3335 = vst [vmem:[#allocation45_spill] sm:$0xff] %v2125_v33  ;;  %v2131_v28 = vld [vmem:[%s1722_s18 + $0x320] sm:$0xff]  ;;  %v2134_v58 = vld [vmem:[%s1722_s18 + $0x2c8] sm:$0xff]  ;;  %v472_v2 = vadd.f32 %v471_v60, %v2102_v19  ;;  %v462_v12 = vadd.f32 %v2128_v26, %v2125_v33  ;;  %v447_v52 = vadd.f32 %v446_v11, %v2107_v49  ;;  %v624_v60 = vsel %vm340_vm0, %v507_v45, 0.0  ;;  %v2153_v30 = vld [vmem:[%s1722_s18 + $0x378] sm:$0xff] }
  0x3e   : > { %v2144_v50 = vld [vmem:[%s1722_s18 + $0x368] sm:$0xff]  ;;  %v622_v43 = vadd.f32 %v621_v36, %v505_v37  ;;  %433 = vadd.xlane.f32.xlu0 %v432_v56  ;;  %v459_v51 = vadd.f32 %v458_v44, %v457_v25  ;;  %v2159_v11 = vld [vmem:[%s1722_s18 + $0x370] sm:$0xff]  ;;  %v2165_v45 = vld [vmem:[%s1722_s18 + $0x340] sm:$0xff]  ;;  %v611_v33 = vadd.f32 %v610_v1, %v1740_v15  ;;  %v500_v25 = vmul.f32 %v1729_v5, %v1729_v5 }
  0x3f   : > { %v2147_v31 = vld [vmem:[%s1722_s18 + $0x328] sm:$0xff]  ;;  %v473_v8 = vadd.f32 %v472_v2, %v2113_v41  ;;  %v463_v9 = vadd.f32 %v462_v12, %v2131_v28  ;;  %v448_v34 = vadd.f32 %v447_v52, %v2134_v58  ;;  %v2162_v26 = vld [vmem:[%s1722_s18 + $0x330] sm:$0xff]  ;;  %v516_v52 = vmul.f32 %v1794_v55, %v1794_v55  ;;  %v2179_v36 = vld [vmem:[%s1722_s18 + $0x338] sm:$0xff] }
  0x40   : > { %460 = vadd.xlane.f32.xlu1 %v459_v51  ;;  %v476_v12 = vsel %vm340_vm0, %v2153_v30, 0.0  ;;  %v612_v15 = vadd.f32 %v611_v33, %v1742_v16  ;;  %v517_v54 = vmul.f32 %v1803_v62, %v1803_v62  ;;  %v467_v5 = vsel %vm340_vm0, %v2165_v45, 0.0 }
  0x41   : > { %v474_v2 = vadd.f32 %v473_v8, %v2144_v50  ;;  %v464_v37 = vadd.f32 %v463_v9, %v2147_v31  ;;  %v450_v44 = vadd.f32 %v449_v20, %v448_v34  ;;  %v623_v55 = vadd.f32 %v622_v43, %v506_v38 }
  0x42   : > { %v613_v20 = vadd.f32 %v612_v15, %v1747_v22  ;;  %v518_v8 = vmul.f32 %v1809_v3, %v1809_v3  ;;  %v521_v16 = vmul.f32 %v1817_v13, %v1817_v13  ;;  %v637_v33 = vadd.f32 %v516_v52, %v515_v29 }
  0x43   : > { %v475_v1 = vadd.f32 %v474_v2, %v2159_v11  ;;  %v465_v56 = vadd.f32 %v464_v37, %v2162_v26  ;;  %451 = vadd.xlane.f32.xlu0 %v450_v44  ;;  %v508_v51 = vmul.f32 %v1812_v4, %v1812_v4  ;;  %v509_v34 = vmul.f32 %v1821_v17, %v1821_v17 }
  0x44   : > { %v615_v38 = vsel %vm340_vm0, %v500_v25, 0.0  ;;  %v519_v22 = vmul.f32 %v1828_v21, %v1828_v21  ;;  %v638_v43 = vadd.f32 %v637_v33, %v517_v54  ;;  %v510_v3 = vmul.f32 %v1824_v18, %v1824_v18  ;;  %v3337_v54 = vld [vmem:[#allocation2_spill] sm:$0xff] }
  0x45   : > { %v477_v9 = vadd.f32 %v476_v12, %v475_v1  ;;  %v466_v62 = vadd.f32 %v465_v56, %v2179_v36  ;;  %v625_v29 = vadd.f32 %v624_v60, %v623_v55  ;;  %v614_v2 = vadd.f32 %v613_v20, %v1749_v23  ;;  %v3338_v56 = vld [vmem:[#allocation6_spill] sm:$0xff] }
  0x46   : > { %v520_v4 = vmul.f32 %v1849_v42, %v1849_v42  ;;  %v639_v37 = vadd.f32 %v638_v43, %v518_v8  ;;  %v642_v17 = vsel %vm340_vm0, %v521_v16, 0.0  ;;  %v511_v25 = vmul.f32 %v1831_v24, %v1831_v24  ;;  %v3341_v8 = vld [vmem:[#allocation5_spill] sm:$0xff] }
  0x47   : > { %478 = vadd.xlane.f32.xlu1 %v477_v9  ;;  %v468_v13 = vadd.f32 %v467_v5, %v466_v62  ;;  %v628_v52 = vadd.f32 %v509_v34, %v508_v51  ;;  %v514_v21 = vmul.f32 %v1857_v48, %v1857_v48  ;;  %v529_v18 = vmul.f32 %v1838_v39, %v1838_v39  ;;  %v3342_v51 = vld [vmem:[#allocation7_spill] sm:$0xff] }
  0x48   : > { %v530_v23 = vmul.f32 %v1841_v32, %v1841_v32  ;;  %v531_v42 = vmul.f32 %v1844_v40, %v1844_v40  ;;  %v640_v60 = vadd.f32 %v639_v37, %v519_v22  ;;  %v512_v44 = vmul.f32 %v1854_v47, %v1854_v47  ;;  %v3339_v47 = vld [vmem:[#allocation3_spill] sm:$0xff]  ;;  %v3343_v22 = vld [vmem:[#allocation8_spill] sm:$0xff]  ;;  %v3345_v37 = vld [vmem:[#allocation9_spill] sm:$0xff] }
  0x49   : > { %469 = vadd.xlane.f32.xlu0 %v468_v13  ;;  %v513_v24 = vmul.f32 %v1874_v10, %v1874_v10  ;;  %v629_v12 = vadd.f32 %v628_v52, %v510_v3  ;;  %v616_v48 = vadd.f32 %v615_v38, %v614_v2  ;;  %v532_v39 = vmul.f32 %v1864_v63, %v1864_v63  ;;  %v3344_v3 = vld [vmem:[#allocation10_spill] sm:$0xff] }
  0x4a   : > { %v655_v15 = vadd.f32 %v530_v23, %v529_v18  ;;  %v522_v32 = vmul.f32 %v3337_v54, %v3337_v54  ;;  %v641_v1 = vadd.f32 %v640_v60, %v520_v4  ;;  %v535_v5 = vmul.f32 %v3338_v56, %v3338_v56  ;;  %v3348_v60 = vld [vmem:[#allocation12_spill] sm:$0xff]  ;;  %v3352_v56 = vld [vmem:[#allocation17_spill] sm:$0xff] }
  0x4b   : > { %608 = vadd.xlane.f32.xlu1 %v2022_v46  ;;  %v630_v40 = vadd.f32 %v629_v12, %v511_v25  ;;  %v523_v55 = vmul.f32 %v3339_v47, %v3339_v47  ;;  %v633_v10 = vsel %vm340_vm0, %v514_v21, 0.0  ;;  %v3340_v46 = vld [vmem:[#allocation4_spill] sm:$0xff]  ;;  %v524_v16 = vmul.f32 %v3341_v8, %v3341_v8  ;;  %v3349_v12 = vld [vmem:[#allocation13_spill] sm:$0xff]  ;;  %v3354_v8 = vld [vmem:[#allocation19_spill] sm:$0xff] }
  0x4c   : > { %v533_v20 = vmul.f32 %v3340_v46, %v3340_v46  ;;  %v656_v63 = vadd.f32 %v655_v15, %v531_v42  ;;  %v643_v33 = vadd.f32 %v642_v17, %v641_v1  ;;  %v534_v62 = vmul.f32 %v1912_v7, %v1912_v7  ;;  %v3347_v21 = vld [vmem:[#allocation16_spill] sm:$0xff] }
  0x4d   : > { %599 = vadd.xlane.f32.xlu0 %v2036_v35  ;;  %v631_v9 = vadd.f32 %v630_v40, %v512_v44  ;;  %v525_v34 = vmul.f32 %v3342_v51, %v3342_v51  ;;  %v646_v35 = vadd.f32 %v523_v55, %v522_v32  ;;  %v543_v43 = vmul.f32 %v3343_v22, %v3343_v22  ;;  %v3351_v32 = vld [vmem:[#allocation14_spill] sm:$0xff]  ;;  %v3353_v55 = vld [vmem:[#allocation15_spill] sm:$0xff] }
  0x4e   : > { %v657_v38 = vadd.f32 %v656_v63, %v532_v39  ;;  %v544_v13 = vmul.f32 %v3344_v3, %v3344_v3  ;;  %v660_v4 = vsel %vm340_vm0, %v535_v5, 0.0  ;;  %v528_v17 = vmul.f32 %v3345_v37, %v3345_v37 }
  0x4f   : > { %626 = vadd.xlane.f32.xlu1 %v625_v29  ;;  %v632_v2 = vadd.f32 %v631_v9, %v513_v24  ;;  %v545_v7 = vmul.f32 %v1909_v61, %v1909_v61  ;;  %v3346_v29 = vld [vmem:[#allocation11_spill] sm:$0xff]  ;;  %v527_v18 = vmul.f32 %v3347_v21, %v3347_v21  ;;  %v647_v23 = vadd.f32 %v646_v35, %v524_v16  ;;  %v3360_v21 = vld [vmem:[#allocation25_spill] sm:$0xff] }
  0x50   : > { %v658_v25 = vadd.f32 %v657_v38, %v533_v20  ;;  %v526_v52 = vmul.f32 %v3346_v29, %v3346_v29  ;;  %v546_v44 = vmul.f32 %v3348_v60, %v3348_v60  ;;  %v673_v24 = vadd.f32 %v544_v13, %v543_v43  ;;  %v3357_v43 = vld [vmem:[#allocation22_spill] sm:$0xff]  ;;  %v3358_v13 = vld [vmem:[#allocation23_spill] sm:$0xff] }
  0x51   : > { %617 = vadd.xlane.f32.xlu0 %v616_v48  ;;  %v634_v42 = vadd.f32 %v633_v10, %v632_v2  ;;  %v536_v39 = vmul.f32 %v3349_v12, %v3349_v12  ;;  %v648_v61 = vadd.f32 %v647_v23, %v525_v34  ;;  %v3350_v48 = vld [vmem:[#allocation18_spill] sm:$0xff]  ;;  %v537_v1 = vmul.f32 %v3351_v32, %v3351_v32  ;;  %v3356_v34 = vld [vmem:[#allocation21_spill] sm:$0xff] }
  0x52   : > { %v659_v15 = vadd.f32 %v658_v25, %v534_v62  ;;  %v549_v54 = vmul.f32 %v3350_v48, %v3350_v48  ;;  %v651_v40 = vsel %vm340_vm0, %v528_v17, 0.0  ;;  %v547_v5 = vmul.f32 %v3352_v56, %v3352_v56  ;;  %v3355_v62 = vld [vmem:[#allocation20_spill] sm:$0xff]  ;;  %v3361_v60 = vld [vmem:[#allocation26_spill] sm:$0xff] }
  0x53   : > { %644 = vadd.xlane.f32.xlu1 %v643_v33  ;;  %v674_v47 = vadd.f32 %v673_v24, %v545_v7  ;;  %v538_v10 = vmul.f32 %v3353_v55, %v3353_v55  ;;  %v649_v20 = vadd.f32 %v648_v61, %v526_v52  ;;  %v548_v63 = vmul.f32 %v1955_v27, %v1955_v27  ;;  %v3359_v25 = vld [vmem:[#allocation24_spill] sm:$0xff]  ;;  %v3362_v24 = vld [vmem:[#allocation27_spill] sm:$0xff]  ;;  %v3364_v32 = vld [vmem:[#allocation34_spill] sm:$0xff] }
  0x54   : > { %v661_v46 = vadd.f32 %v660_v4, %v659_v15  ;;  %v539_v16 = vmul.f32 %v3354_v8, %v3354_v8  ;;  %v664_v9 = vadd.f32 %v537_v1, %v536_v39  ;;  %v557_v51 = vmul.f32 %v3355_v62, %v3355_v62  ;;  %v3363_v15 = vld [vmem:[#allocation28_spill] sm:$0xff]  ;;  %v3366_v55 = vld [vmem:[#allocation31_spill] sm:$0xff]  ;;  %v3368_v8 = vld [vmem:[#allocation30_spill] sm:$0xff] }
  0x55   : > { %635 = vadd.xlane.f32.xlu0 %v634_v42  ;;  %v675_v33 = vadd.f32 %v674_v47, %v546_v44  ;;  %v558_v38 = vmul.f32 %v3356_v34, %v3356_v34  ;;  %v650_v35 = vadd.f32 %v649_v20, %v527_v18  ;;  %v678_v22 = vsel %vm340_vm0, %v549_v54, 0.0 }
  0x56   : > { %v542_v3 = vmul.f32 %v3357_v43, %v3357_v43  ;;  %v559_v27 = vmul.f32 %v3358_v13, %v3358_v13  ;;  %v540_v4 = vmul.f32 %v1969_v14, %v1969_v14  ;;  %v541_v37 = vmul.f32 %v1983_v57, %v1983_v57  ;;  %v3371_v43 = vld [vmem:[#allocation36_spill] sm:$0xff] }
  0x57   : > { %662 = vadd.xlane.f32.xlu1 %v661_v46  ;;  %v676_v2 = vadd.f32 %v675_v33, %v547_v5  ;;  %v665_v17 = vadd.f32 %v664_v9, %v538_v10  ;;  %v652_v7 = vadd.f32 %v651_v40, %v650_v35  ;;  %v560_v29 = vmul.f32 %v3359_v25, %v3359_v25  ;;  %v3365_v40 = vld [vmem:[#allocation29_spill] sm:$0xff]  ;;  %v3367_v46 = vld [vmem:[#allocation32_spill] sm:$0xff] }
  0x58   : > { %v691_v52 = vadd.f32 %v558_v38, %v557_v51  ;;  %v550_v18 = vmul.f32 %v3360_v21, %v3360_v21  ;;  %v563_v44 = vmul.f32 %v3361_v60, %v3361_v60  ;;  %v551_v14 = vmul.f32 %v3362_v24, %v3362_v24  ;;  %v3369_v33 = vld [vmem:[#allocation33_spill] sm:$0xff]  ;;  %v3370_v51 = vld [vmem:[#allocation35_spill] sm:$0xff] }
  0x59   : > { %v677_v23 = vadd.f32 %v676_v2, %v548_v63  ;;  %v666_v42 = vadd.f32 %v665_v17, %v539_v16  ;;  %653 = vadd.xlane.f32.xlu0 %v652_v7  ;;  %v669_v57 = vsel %vm340_vm0, %v542_v3, 0.0  ;;  %v561_v12 = vmul.f32 %v2012_v6, %v2012_v6  ;;  %v3373_v7 = vld [vmem:[#allocation38_spill] sm:$0xff]  ;;  %v3376_v24 = vld [vmem:[#allocation41_spill] sm:$0xff] }
  0x5a   : > { %v692_v39 = vadd.f32 %v691_v52, %v559_v27  ;;  %v552_v61 = vmul.f32 %v3363_v15, %v3363_v15  ;;  %v562_v1 = vmul.f32 %v3364_v32, %v3364_v32  ;;  %v553_v56 = vmul.f32 %v3365_v40, %v3365_v40  ;;  %v3372_v27 = vld [vmem:[#allocation37_spill] sm:$0xff]  ;;  %v3378_v15 = vld [vmem:[#allocation43_spill] sm:$0xff]  ;;  %v3379_v40 = vld [vmem:[#allocation44_spill] sm:$0xff] }
  0x5b   : > { %v679_v48 = vadd.f32 %v678_v22, %v677_v23  ;;  %v667_v54 = vadd.f32 %v666_v42, %v540_v4  ;;  %v682_v47 = vadd.f32 %v551_v14, %v550_v18  ;;  %v571_v10 = vmul.f32 %v3366_v55, %v3366_v55  ;;  %v3375_v18 = vld [vmem:[#allocation40_spill] sm:$0xff] }
  0x5c   : > { %v693_v5 = vadd.f32 %v692_v39, %v560_v29  ;;  %v572_v6 = vmul.f32 %v3367_v46, %v3367_v46  ;;  %v696_v63 = vsel %vm340_vm0, %v563_v44, 0.0  ;;  %v556_v16 = vmul.f32 %v3368_v8, %v3368_v8  ;;  %v3374_v29 = vld [vmem:[#allocation39_spill] sm:$0xff]  ;;  %v3380_v46 = vld [vmem:[#allocation45_spill] sm:$0xff]  ;;  %v3381_v8 = vld [vmem:[#allocation46_spill] sm:$0xff] }
  0x5d   : > { %680 = vadd.xlane.f32.xlu1 %v679_v48  ;;  %v668_v20 = vadd.f32 %v667_v54, %v541_v37  ;;  %v573_v9 = vmul.f32 %v3369_v33, %v3369_v33  ;;  %v554_v34 = vmul.f32 %v3370_v51, %v3370_v51  ;;  %v555_v38 = vmul.f32 %v2065_v53, %v2065_v53 }
  0x5e   : > { %v694_v62 = vadd.f32 %v693_v5, %v561_v12  ;;  %v683_v35 = vadd.f32 %v682_v47, %v552_v61  ;;  %v574_v3 = vmul.f32 %v3371_v43, %v3371_v43  ;;  %v709_v13 = vadd.f32 %v572_v6, %v571_v10  ;;  %v3377_v12 = vld [vmem:[#allocation42_spill] sm:$0xff] }
  0x5f   : > { %v670_v22 = vadd.f32 %v669_v57, %v668_v20  ;;  %v564_v2 = vmul.f32 %v3372_v27, %v3372_v27  ;;  %v577_v17 = vmul.f32 %v2081_v59, %v2081_v59  ;;  %v565_v25 = vmul.f32 %v3373_v7, %v3373_v7 }
  0x60   : > { %v695_v4 = vadd.f32 %v694_v62, %v562_v1  ;;  %v684_v37 = vadd.f32 %v683_v35, %v553_v56  ;;  %v687_v53 = vsel %vm340_vm0, %v556_v16, 0.0  ;;  %v575_v52 = vmul.f32 %v3374_v29, %v3374_v29 }
  0x61   : > { %671 = vadd.xlane.f32.xlu0 %v670_v22  ;;  %v710_v21 = vadd.f32 %v709_v13, %v573_v9  ;;  %v566_v23 = vmul.f32 %v3375_v18, %v3375_v18  ;;  %v576_v44 = vmul.f32 %v2094_v0, %v2094_v0  ;;  %v567_v59 = vmul.f32 %v3376_v24, %v3376_v24 }
  0x62   : > { %v697_v42 = vadd.f32 %v696_v63, %v695_v4  ;;  %v685_v60 = vadd.f32 %v684_v37, %v554_v34  ;;  %v700_v57 = vadd.f32 %v565_v25, %v564_v2  ;;  %v585_v39 = vmul.f32 %v3377_v12, %v3377_v12 }
  0x63   : > { %v711_v14 = vadd.f32 %v710_v21, %v574_v3  ;;  %v586_v61 = vmul.f32 %v3378_v15, %v3378_v15  ;;  %v714_v54 = vsel %vm340_vm0, %v577_v17, 0.0  ;;  %v587_v32 = vmul.f32 %v2102_v19, %v2102_v19 }
  0x64   : > { %698 = vadd.xlane.f32.xlu1 %v697_v42  ;;  %v686_v48 = vadd.f32 %v685_v60, %v555_v38  ;;  %v568_v0 = vmul.f32 %v2107_v49, %v2107_v49  ;;  %v570_v56 = vmul.f32 %v3379_v40, %v3379_v40  ;;  %v701_v5 = vadd.f32 %v700_v57, %v566_v23 }
  0x65   : > { %v712_v1 = vadd.f32 %v711_v14, %v575_v52  ;;  %v588_v55 = vmul.f32 %v2113_v41, %v2113_v41  ;;  %v727_v10 = vadd.f32 %v586_v61, %v585_v39  ;;  %v578_v6 = vmul.f32 %v3380_v46, %v3380_v46 }
  0x66   : > { %v688_v47 = vadd.f32 %v687_v53, %v686_v48  ;;  %v569_v19 = vmul.f32 %v2134_v58, %v2134_v58  ;;  %v702_v63 = vadd.f32 %v701_v5, %v567_v59  ;;  %v579_v49 = vmul.f32 %v3381_v8, %v3381_v8 }
  0x67   : > { %v713_v20 = vadd.f32 %v712_v1, %v576_v44  ;;  %v589_v16 = vmul.f32 %v2144_v50, %v2144_v50  ;;  %v728_v33 = vadd.f32 %v727_v10, %v587_v32  ;;  %v580_v41 = vmul.f32 %v2131_v28, %v2131_v28 }
  0x68   : > { %689 = vadd.xlane.f32.xlu0 %v688_v47  ;;  %v703_v62 = vadd.f32 %v702_v63, %v568_v0  ;;  %v705_v51 = vsel %vm340_vm0, %v570_v56, 0.0  ;;  %v591_v34 = vmul.f32 %v2153_v30, %v2153_v30  ;;  %v590_v58 = vmul.f32 %v2159_v11, %v2159_v11 }
  0x69   : > { %v715_v9 = vadd.f32 %v714_v54, %v713_v20  ;;  %v729_v38 = vadd.f32 %v728_v33, %v588_v55  ;;  %v581_v35 = vmul.f32 %v2147_v31, %v2147_v31  ;;  %v718_v22 = vadd.f32 %v579_v49, %v578_v6 }
  0x6a   : > { %v704_v50 = vadd.f32 %v703_v62, %v569_v19  ;;  %v582_v28 = vmul.f32 %v2162_v26, %v2162_v26  ;;  %v732_v27 = vsel %vm340_vm0, %v591_v34, 0.0  ;;  %v584_v30 = vmul.f32 %v2165_v45, %v2165_v45 }
  0x6b   : > { %716 = vadd.xlane.f32.xlu1 %v715_v9  ;;  %v730_v43 = vadd.f32 %v729_v38, %v589_v16  ;;  %v719_v3 = vadd.f32 %v718_v22, %v580_v41  ;;  %v583_v11 = vmul.f32 %v2179_v36, %v2179_v36  ;;  %v1685_v25 = vmov 0  }
  0x6c   : > { %v706_v13 = vadd.f32 %v705_v51, %v704_v50  ;;  %v723_v17 = vsel %vm340_vm0, %v584_v30, 0.0  ;;  %1532 = vset.pattern.permute.xlu1 %v1685_v25  ;;  %1531 = vset.pattern.permute.xlu0 %v1685_v25 }
  0x6d   : > { %v731_v2 = vadd.f32 %v730_v43, %v590_v58  ;;  %v720_v4 = vadd.f32 %v719_v3, %v581_v35 }
  0x6e   : > { %707 = vadd.xlane.f32.xlu0 %v706_v13 }
  0x6f   : > { %v733_v31 = vadd.f32 %v732_v27, %v731_v2  ;;  %v721_v37 = vadd.f32 %v720_v4, %v582_v28 }
  0x71   : > { %734 = vadd.xlane.f32.xlu1 %v733_v31  ;;  %v722_v7 = vadd.f32 %v721_v37, %v583_v11 }
  0x73   : > { %v724_v26 = vadd.f32 %v723_v17, %v722_v7 }
  0x75   : > { %725 = vadd.xlane.f32.xlu0 %v724_v26 }
  0xae   : > { %v362_v53 = vpop.xlane.xlu1 %361 }
  0xaf   : > { %v2390_v1 = vmul.f32 0.0012755102, %v362_v53 }
  0xb0   : > { %v344_v29 = vpop.xlane.xlu0 %343 }
  0xb1   : > { %v2384_v15 = vmul.f32 0.0012755102, %v344_v29  ;;  %v770_v20 = vmul.f32 %v2390_v1, %v2390_v1  ;;  %v849_v29 = vld [vmem:[%s2414_s22 + $0x8] sm:$0xff] }
  0xb3   : > { %v371_v45 = vpop.xlane.xlu1 %370  ;;  %v768_v40 = vmul.f32 %v2384_v15, %v2384_v15 }
  0xb4   : > { %v2386_v48 = vmul.f32 0.0012755102, %v371_v45 }
  0xb5   : > { %v353_v52 = vpop.xlane.xlu0 %352 }
  0xb6   : > { %v2380_v12 = vmul.f32 0.0012755102, %v353_v52  ;;  %v771_v55 = vmul.f32 %v2386_v48, %v2386_v48 }
  0xb7   : > { %v389_v21 = vpop.xlane.xlu1 %388 }
  0xb8   : > { %v769_v54 = vmul.f32 %v2380_v12, %v2380_v12  ;;  %v2398_v19 = vmul.f32 0.0012755102, %v389_v21 }
  0xba   : > { %v380_v18 = vpop.xlane.xlu0 %379  ;;  %v773_v58 = vmul.f32 %v2398_v19, %v2398_v19 }
  0xbb   : > { %v2400_v63 = vmul.f32 0.0012755102, %v380_v18 }
  0xbd   : > { %v407_v36 = vpop.xlane.xlu1 %406  ;;  %v772_v22 = vmul.f32 %v2400_v63, %v2400_v63 }
  0xbe   : > { %v2416_v11 = vmul.f32 0.0012755102, %v407_v36  ;;  %v848_v36 = vld [vmem:[%s2414_s22] sm:$0xff] }
  0xbf   : > { %v398_v23 = vpop.xlane.xlu0 %397 }
  0xc0   : > { %v2407_v28 = vmul.f32 0.0012755102, %v398_v23  ;;  %v775_v52 = vmul.f32 %v2416_v11, %v2416_v11 }
  0xc2   : > { %v425_v42 = vpop.xlane.xlu1 %424  ;;  %v774_v31 = vmul.f32 %v2407_v28, %v2407_v28 }
  0xc3   : > { %v2420_v37 = vmul.f32 0.0012755102, %v425_v42 }
  0xc4   : > { %v2368_v60 = vpop.xlane.xlu0 %415 }
  0xc5   : > { %v777_v23 = vmul.f32 %v2420_v37, %v2420_v37  ;;  %v2429_v42 = vmul.f32 0.0012755102, %v2368_v60 }
  0xc7   : > { %v776_v60 = vmul.f32 %v2429_v42, %v2429_v42 }
  0xc8   : > { %v2370_v44 = vpop.xlane.xlu1 %442 }
  0xcb   : > { %v2372_v24 = vpop.xlane.xlu0 %433 }
  0xcd   : > { %v2374_v59 = vpop.xlane.xlu1 %460 }
  0xd0   : > { %v2376_v14 = vpop.xlane.xlu0 %451 }
  0xd4   : > { %v2378_v57 = vpop.xlane.xlu1 %478 }
  0xd6   : > { %v2382_v39 = vpop.xlane.xlu0 %469 }
  0xd8   : > { %v609_v61 = vpop.xlane.xlu1 %608 }
  0xd9   : > { %v753_v32 = vmul.f32 0.0012755102, %v609_v61 }
  0xda   : > { %v600_v0 = vpop.xlane.xlu0 %599 }
  0xdb   : > { %v785_v56 = vsub.f32 %v753_v32, %v769_v54  ;;  %v752_v5 = vmul.f32 0.0012755102, %v600_v0 }
  0xdc   : > { %v627_v47 = vpop.xlane.xlu1 %626 }
  0xdd   : > { %v801_v10 = vmax.f32 %v785_v56, 0.0  ;;  %v784_v46 = vsub.f32 %v752_v5, %v768_v40  ;;  %v755_v6 = vmul.f32 0.0012755102, %v627_v47 }
  0xde   : > { %v618_v8 = vpop.xlane.xlu0 %617 }
  0xdf   : > { %v817_v49 = vadd.f32 1e-05, %v801_v10  ;;  %v800_v16 = vmax.f32 %v784_v46, 0.0  ;;  %v787_v33 = vsub.f32 %v755_v6, %v771_v55  ;;  %v754_v41 = vmul.f32 0.0012755102, %v618_v8  ;;  %v850_v46 = vld [vmem:[%s2414_s22 + $0x10] sm:$0xff] }
  0xe0   : > { %v645_v9 = vpop.xlane.xlu1 %644  ;;  %v2437_v55 = vmul.f32 0.0012755102, %v2370_v44 }
  0xe1   : > { %1533 = vrsqrt.f32 %v817_v49  ;;  %v816_v62 = vadd.f32 1e-05, %v800_v16  ;;  %v803_v51 = vmax.f32 %v787_v33, 0.0  ;;  %v786_v34 = vsub.f32 %v754_v41, %v770_v20 }
  0xe2   : > { %v757_v38 = vmul.f32 0.0012755102, %v645_v9  ;;  %v636_v35 = vpop.xlane.xlu0 %635 }
  0xe3   : > { %1535 = vrsqrt.f32 %v816_v62  ;;  %v802_v50 = vmax.f32 %v786_v34, 0.0  ;;  %v756_v43 = vmul.f32 0.0012755102, %v636_v35  ;;  %v819_v3 = vadd.f32 1e-05, %v803_v51 }
  0xe4   : > { %v789_v27 = vsub.f32 %v757_v38, %v773_v58  ;;  %v663_v2 = vpop.xlane.xlu1 %662  ;;  %v779_v51 = vmul.f32 %v2437_v55, %v2437_v55  ;;  %v2448_v34 = vmul.f32 0.0012755102, %v2372_v24  ;;  %v851_v38 = vld [vmem:[%s2414_s22 + $0x18] sm:$0xff] }
  0xe5   : > { %v818_v13 = vadd.f32 1e-05, %v802_v50  ;;  %v788_v30 = vsub.f32 %v756_v43, %v772_v22  ;;  %v759_v17 = vmul.f32 0.0012755102, %v663_v2  ;;  %v2453_v43 = vmul.f32 0.0012755102, %v2374_v59 }
  0xe6   : > { %v654_v7 = vpop.xlane.xlu0 %653  ;;  %v805_v26 = vmax.f32 %v789_v27, 0.0  ;;  %v778_v24 = vmul.f32 %v2448_v34, %v2448_v34 }
  0xe7   : > { %1537 = vrsqrt.f32 %v818_v13  ;;  %v804_v4 = vmax.f32 %v788_v30, 0.0  ;;  %v758_v53 = vmul.f32 0.0012755102, %v654_v7  ;;  %v791_v40 = vsub.f32 %v759_v17, %v775_v52 }
  0xe8   : > { %1539 = vrsqrt.f32 %v819_v3  ;;  %v821_v0 = vadd.f32 1e-05, %v805_v26  ;;  %v781_v26 = vmul.f32 %v2453_v43, %v2453_v43 }
  0xe9   : > { %v820_v25 = vadd.f32 1e-05, %v804_v4  ;;  %v790_v21 = vsub.f32 %v758_v53, %v774_v31  ;;  %v807_v49 = vmax.f32 %v791_v40, 0.0  ;;  %v852_v4 = vld [vmem:[%s2414_s22 + $0x20] sm:$0xff] }
  0xea   : > { %v681_v18 = vpop.xlane.xlu1 %680 }
  0xeb   : > { %v1534_v45 = vpop.eup %1533  ;;  %v761_v61 = vmul.f32 0.0012755102, %v681_v18  ;;  %1541 = vrsqrt.f32 %v820_v25  ;;  %v806_v56 = vmax.f32 %v790_v21, 0.0  ;;  %v823_v35 = vadd.f32 1e-05, %v807_v49  ;;  %v853_v21 = vld [vmem:[%s2414_s22 + $0x28] sm:$0xff] }
  0xec   : > { %v2431_v54 = vmul.f32 %v1534_v45, %v849_v29  ;;  %1543 = vrsqrt.f32 %v821_v0  ;;  %v2464_v25 = vmul.f32 0.0012755102, %v2376_v14  ;;  %v2485_v49 = vmul.f32 0.0012755102, %v2382_v39 }
  0xed   : > { %v1536_v32 = vpop.eup %1535  ;;  %v793_v5 = vsub.f32 %v761_v61, %v777_v23  ;;  %v822_v16 = vadd.f32 1e-05, %v806_v56  ;;  %v2472_v23 = vmul.f32 0.0012755102, %v2378_v57 }
  0xee   : > { %935 = vperm.xlu1 %1532, %v2431_v54   ;;  %v2434_v47 = vmul.f32 %v1536_v32, %v848_v36  ;;  %v672_v10 = vpop.xlane.xlu0 %671  ;;  %v857_v36 = vld [vmem:[%s2414_s22 + $0x48] sm:$0xff]  ;;  %v780_v0 = vmul.f32 %v2464_v25, %v2464_v25 }
  0xef   : > { %v809_v6 = vmax.f32 %v793_v5, 0.0  ;;  %v760_v20 = vmul.f32 0.0012755102, %v672_v10 }
  0xf0   : > { %930 = vperm.xlu0 %1531, %v2434_v47  }
  0xf1   : > { %v1538_v8 = vpop.eup %1537  ;;  %v825_v33 = vadd.f32 1e-05, %v809_v6  ;;  %v792_v41 = vsub.f32 %v760_v20, %v776_v60  ;;  %v699_v9 = vpop.xlane.xlu1 %698  ;;  %v854_v60 = vld [vmem:[%s2414_s22 + $0x30] sm:$0xff] }
  0xf2   : > { %v2443_v62 = vmul.f32 %v1538_v8, %v850_v46  ;;  %v1540_v44 = vpop.eup %1539  ;;  %v763_v58 = vmul.f32 0.0012755102, %v699_v9  ;;  %v783_v8 = vmul.f32 %v2472_v23, %v2472_v23 }
  0xf3   : > { %1545 = vrsqrt.f32 %v825_v33  ;;  %v808_v22 = vmax.f32 %v792_v41, 0.0  ;;  %v2455_v13 = vmul.f32 %v1540_v44, %v851_v38 }
  0xf4   : > { %940 = vperm.xlu1 %1532, %v2443_v62   ;;  %1547 = vrsqrt.f32 %v822_v16  ;;  %v795_v50 = vsub.f32 %v763_v58, %v779_v51  ;;  %v859_v51 = vld [vmem:[%s2414_s22 + $0x58] sm:$0xff] }
  0xf5   : > { %v690_v3 = vpop.xlane.xlu0 %689  ;;  %v1542_v27 = vpop.eup %1541  ;;  %1549 = vrsqrt.f32 %v823_v35  ;;  %v824_v31 = vadd.f32 1e-05, %v808_v22  ;;  %v855_v58 = vld [vmem:[%s2414_s22 + $0x38] sm:$0xff]  ;;  %v782_v22 = vmul.f32 %v2485_v49, %v2485_v49 }
  0xf6   : > { %v811_v30 = vmax.f32 %v795_v50, 0.0  ;;  %v762_v2 = vmul.f32 0.0012755102, %v690_v3  ;;  %v2466_v29 = vmul.f32 %v1542_v27, %v852_v4  ;;  %v1544_v45 = vpop.eup %1543 }
  0xf7   : > { %v2476_v5 = vmul.f32 %v1544_v45, %v853_v21  ;;  %v858_v45 = vld [vmem:[%s2414_s22 + $0x50] sm:$0xff] }
  0xf8   : > { %945 = vperm.xlu1 %1532, %v2455_v13   ;;  %v827_v17 = vadd.f32 1e-05, %v811_v30  ;;  %v794_v7 = vsub.f32 %v762_v2, %v778_v24  ;;  %v717_v59 = vpop.xlane.xlu1 %716 }
  0xf9   : > { %v765_v53 = vmul.f32 0.0012755102, %v717_v59 }
  0xfa   : > { %1551 = vrsqrt.f32 %v827_v17  ;;  %v810_v52 = vmax.f32 %v794_v7, 0.0  ;;  %v861_v7 = vld [vmem:[%s2414_s22 + $0x68] sm:$0xff] }
  0xfb   : > { %v797_v18 = vsub.f32 %v765_v53, %v781_v26  ;;  %1553 = vrsqrt.f32 %v824_v31  ;;  %v708_v32 = vpop.xlane.xlu0 %707  ;;  %v856_v31 = vld [vmem:[%s2414_s22 + $0x40] sm:$0xff] }
  0xfc   : > { %950 = vperm.xlu1 %1532, %v2466_v29   ;;  %v826_v61 = vadd.f32 1e-05, %v810_v52  ;;  %v764_v56 = vmul.f32 0.0012755102, %v708_v32  ;;  %v863_v32 = vld [vmem:[%s2414_s22 + $0x78] sm:$0xff] }
  0xfd   : > { %v1546_v14 = vpop.eup %1545  ;;  %v813_v40 = vmax.f32 %v797_v18, 0.0 }
  0xfe   : > { %v1548_v10 = vpop.eup %1547  ;;  %v2478_v46 = vmul.f32 %v1546_v14, %v857_v36  ;;  %v796_v57 = vsub.f32 %v764_v56, %v780_v0  ;;  %v735_v20 = vpop.xlane.xlu1 %734  ;;  %1555 = vrsqrt.f32 %v826_v61  ;;  %v860_v36 = vld [vmem:[%s2414_s22 + $0x60] sm:$0xff]  ;;  %v897_v56 = vmul.f32 %v2431_v54, %v2380_v12 }
  0xff   : > { %v829_v6 = vadd.f32 1e-05, %v813_v40  ;;  %v767_v16 = vmul.f32 0.0012755102, %v735_v20  ;;  %v2488_v41 = vmul.f32 %v1548_v10, %v854_v60  ;;  %v1550_v9 = vpop.eup %1549  ;;  %v881_v10 = vld [vmem:[%s2508_s25 + $0x8] sm:$0xff]  ;;  %v862_v60 = vld [vmem:[%s2414_s22 + $0x70] sm:$0xff]  ;;  %v899_v20 = vmul.f32 %v2455_v13, %v2386_v48 }
 0x100   : > { %955 = vperm.xlu1 %1532, %v2476_v5   ;;  %975 = vperm.xlu0 %1531, %v2478_v46   ;;  %v812_v33 = vmax.f32 %v796_v57, 0.0  ;;  %v871_v24 = vmul.f32 %v1550_v9, %v855_v58  ;;  %v913_v57 = vsub.f32 %v881_v10, %v897_v56  ;;  %v880_v9 = vld [vmem:[%s2508_s25] sm:$0xff]  ;;  %v901_v54 = vmul.f32 %v2476_v5, %v2398_v19  ;;  %v885_v58 = vld [vmem:[%s2508_s25 + $0x28] sm:$0xff]  ;;  %v882_v48 = vld [vmem:[%s2508_s25 + $0x10] sm:$0xff] }
 0x101   : > { %1557 = vrsqrt.f32 %v829_v6  ;;  %v799_v44 = vsub.f32 %v767_v16, %v783_v8  ;;  %v896_v16 = vmul.f32 %v2434_v47, %v2384_v15  ;;  %v884_v19 = vld [vmem:[%s2508_s25 + $0x20] sm:$0xff]  ;;  %v1568_v10 = vld [vmem:[%s1722_s18 + $0x50] sm:$0xff] }
 0x102   : > { %v828_v38 = vadd.f32 1e-05, %v812_v33  ;;  %v726_v35 = vpop.xlane.xlu0 %725  ;;  %v883_v33 = vld [vmem:[%s2508_s25 + $0x18] sm:$0xff]  ;;  %v917_v15 = vsub.f32 %v885_v58, %v901_v54  ;;  %v903_v47 = vmul.f32 %v871_v24, %v2416_v11  ;;  %v886_v11 = vld [vmem:[%s2508_s25 + $0x30] sm:$0xff]  ;;  %v1573_v54 = vld [vmem:[%s1722_s18 + $0x8] sm:$0xff] }
 0x103   : > { %v815_v50 = vmax.f32 %v799_v44, 0.0  ;;  %v766_v3 = vmul.f32 0.0012755102, %v726_v35  ;;  %v915_v12 = vsub.f32 %v883_v33, %v899_v20  ;;  %v912_v44 = vsub.f32 %v880_v9, %v896_v16  ;;  %v887_v35 = vld [vmem:[%s2508_s25 + $0x38] sm:$0xff]  ;;  %v1570_v20 = vld [vmem:[%s1722_s18 + $0x60] sm:$0xff]  ;;  %v1571_v16 = vld [vmem:[%s1722_s18 + $0x68] sm:$0xff] }
 0x104   : > { %960 = vperm.xlu1 %1532, %v2488_v41   ;;  %v1552_v39 = vpop.eup %1551  ;;  %1559 = vrsqrt.f32 %v828_v38  ;;  %v900_v38 = vmul.f32 %v2466_v29, %v2400_v63  ;;  %v1572_v9 = vld [vmem:[%s1722_s18] sm:$0xff] }
 0x105   : > { %v2495_v27 = vmul.f32 %v1552_v39, %v859_v51  ;;  %v1554_v30 = vpop.eup %1553  ;;  %v831_v2 = vadd.f32 1e-05, %v815_v50  ;;  %v798_v4 = vsub.f32 %v766_v3, %v782_v22  ;;  %v898_v51 = vmul.f32 %v2443_v62, %v2390_v1  ;;  %v889_v22 = vld [vmem:[%s2508_s25 + $0x48] sm:$0xff] }
 0x106   : > { %v872_v59 = vmul.f32 %v1554_v30, %v856_v31  ;;  %v919_v1 = vsub.f32 %v887_v35, %v903_v47  ;;  %v905_v62 = vmul.f32 %v2478_v46, %v2420_v37  ;;  %v916_v5 = vsub.f32 %v884_v19, %v900_v38  ;;  %v888_v37 = vld [vmem:[%s2508_s25 + $0x40] sm:$0xff]  ;;  %v1577_v38 = vld [vmem:[%s1722_s18 + $0x28] sm:$0xff]  ;;  %v1578_v19 = vld [vmem:[%s1722_s18 + $0x30] sm:$0xff] }
 0x107   : > { %985 = vperm.xlu0 %1531, %v2495_v27   ;;  %1561 = vrsqrt.f32 %v831_v2  ;;  %v814_v17 = vmax.f32 %v798_v4, 0.0  ;;  %v914_v13 = vsub.f32 %v882_v48, %v898_v51  ;;  %v902_v39 = vmul.f32 %v2488_v41, %v2407_v28  ;;  %v893_v2 = vld [vmem:[%s2508_s25 + $0x68] sm:$0xff]  ;;  %v890_v4 = vld [vmem:[%s2508_s25 + $0x50] sm:$0xff]  ;;  %v1575_v48 = vld [vmem:[%s1722_s18 + $0x18] sm:$0xff] }
 0x108   : > { %965 = vperm.xlu1 %1532, %v871_v24   ;;  %v1556_v26 = vpop.eup %1555  ;;  %v921_v63 = vsub.f32 %v889_v22, %v905_v62  ;;  %v907_v29 = vmul.f32 %v2495_v27, %v2437_v55  ;;  %v904_v3 = vmul.f32 %v872_v59, %v2429_v42  ;;  %v891_v24 = vld [vmem:[%s2508_s25 + $0x58] sm:$0xff]  ;;  %v1574_v51 = vld [vmem:[%s1722_s18 + $0x10] sm:$0xff]  ;;  %v1576_v47 = vld [vmem:[%s1722_s18 + $0x20] sm:$0xff] }
 0x109   : > { %v830_v53 = vadd.f32 1e-05, %v814_v17  ;;  %v874_v18 = vmul.f32 %v1556_v26, %v858_v45  ;;  %v918_v50 = vsub.f32 %v886_v11, %v902_v39  ;;  %v895_v17 = vld [vmem:[%s2508_s25 + $0x78] sm:$0xff]  ;;  %v894_v26 = vld [vmem:[%s2508_s25 + $0x70] sm:$0xff]  ;;  %v1581_v11 = vld [vmem:[%s1722_s18 + $0x80] sm:$0xff] }
 0x10a   : > { %v923_v28 = vsub.f32 %v891_v24, %v907_v29  ;;  %v920_v41 = vsub.f32 %v888_v37, %v904_v3  ;;  %v1579_v62 = vld [vmem:[%s1722_s18 + $0x70] sm:$0xff]  ;;  %v1580_v39 = vld [vmem:[%s1722_s18 + $0x78] sm:$0xff] }
 0x10b   : > { %v1558_v52 = vpop.eup %1557  ;;  %1563 = vrsqrt.f32 %v830_v53  ;;  %v906_v30 = vmul.f32 %v874_v18, %v2448_v34  ;;  %v1583_v24 = vld [vmem:[%s1722_s18 + $0x90] sm:$0xff] }
 0x10c   : > { %970 = vperm.xlu1 %1532, %v872_v59   ;;  %v877_v21 = vmul.f32 %v1558_v52, %v861_v7  ;;  %v892_v7 = vld [vmem:[%s2508_s25 + $0x60] sm:$0xff] }
 0x10d   : > { %v922_v27 = vsub.f32 %v890_v4, %v906_v30 }
 0x10e   : > { %995 = vperm.xlu0 %1531, %v877_v21   ;;  %v1560_v61 = vpop.eup %1559  ;;  %v909_v46 = vmul.f32 %v877_v21, %v2453_v43 }
 0x10f   : > { %v876_v14 = vmul.f32 %v1560_v61, %v860_v36 }
 0x110   : > { %980 = vperm.xlu1 %1532, %v874_v18   ;;  %v925_v55 = vsub.f32 %v893_v2, %v909_v46  ;;  %v1586_v2 = vld [vmem:[%s1722_s18 + $0xa8] sm:$0xff] }
 0x111   : > { %v1562_v0 = vpop.eup %1561  ;;  %v908_v31 = vmul.f32 %v876_v14, %v2464_v25 }
 0x112   : > { %v879_v40 = vmul.f32 %v1562_v0, %v863_v32 }
 0x113   : > { %v924_v59 = vsub.f32 %v892_v7, %v908_v31 }
 0x114   : > { %990 = vperm.xlu1 %1532, %v876_v14   ;;  %1005 = vperm.xlu0 %1531, %v879_v40   ;;  %v911_v42 = vmul.f32 %v879_v40, %v2472_v23  ;;  %v1566_v14 = vld [vmem:[%s1722_s18 + $0x40] sm:$0xff]  ;;  %v1567_v40 = vld [vmem:[%s1722_s18 + $0x48] sm:$0xff] }
 0x115   : > { %v1564_v6 = vpop.eup %1563 }
 0x116   : > { %v878_v8 = vmul.f32 %v1564_v6, %v862_v60  ;;  %v927_v43 = vsub.f32 %v895_v17, %v911_v42  ;;  %v1569_v6 = vld [vmem:[%s1722_s18 + $0x58] sm:$0xff]  ;;  %v1589_v17 = vld [vmem:[%s1722_s18 + $0xc0] sm:$0xff] }
 0x118   : > { %1127 = vperm.xlu0 %1531, %v913_v57   ;;  %1000 = vperm.xlu1 %1532, %v878_v8   ;;  %v910_v34 = vmul.f32 %v878_v8, %v2485_v49  ;;  %v1565_v49 = vld [vmem:[%s1722_s18 + $0x38] sm:$0xff] }
 0x11a   : > { %v926_v53 = vsub.f32 %v894_v26, %v910_v34  ;;  %v1591_v26 = vld [vmem:[%s1722_s18 + $0xd0] sm:$0xff] }
 0x11c   : > { %1137 = vperm.xlu0 %1531, %v915_v12   ;;  %1122 = vperm.xlu1 %1532, %v912_v44  }
 0x120   : > { %1147 = vperm.xlu0 %1531, %v917_v15   ;;  %1132 = vperm.xlu1 %1532, %v914_v13  }
 0x124   : > { %1157 = vperm.xlu0 %1531, %v919_v1   ;;  %1142 = vperm.xlu1 %1532, %v916_v5  }
 0x128   : > { %1167 = vperm.xlu0 %1531, %v921_v63   ;;  %1152 = vperm.xlu1 %1532, %v918_v50   ;;  %v1582_v50 = vld [vmem:[%s1722_s18 + $0x88] sm:$0xff] }
 0x12c   : > { %1177 = vperm.xlu0 %1531, %v923_v28   ;;  %1162 = vperm.xlu1 %1532, %v920_v41   ;;  %v1584_v28 = vld [vmem:[%s1722_s18 + $0x98] sm:$0xff]  ;;  %v1585_v41 = vld [vmem:[%s1722_s18 + $0xa0] sm:$0xff] }
 0x130   : > { %1187 = vperm.xlu0 %1531, %v925_v55   ;;  %1172 = vperm.xlu1 %1532, %v922_v27   ;;  %v1587_v55 = vld [vmem:[%s1722_s18 + $0xb0] sm:$0xff]  ;;  %v1588_v27 = vld [vmem:[%s1722_s18 + $0xb8] sm:$0xff] }
 0x134   : > { %1197 = vperm.xlu0 %1531, %v927_v43   ;;  %1182 = vperm.xlu1 %1532, %v924_v59   ;;  %v1590_v59 = vld [vmem:[%s1722_s18 + $0xc8] sm:$0xff] }
 0x138   : > { %1192 = vperm.xlu1 %1532, %v926_v53  }
 0x16d   : > { %v936_v23 = vpop.permute.xlu1 %935 }
 0x16e   : > { %v2559_v36 = vmul.f32 %v1565_v49, %v936_v23  ;;  %v2566_v0 = vmul.f32 %v1566_v14, %v936_v23  ;;  %v2569_v56 = vmul.f32 %v1567_v40, %v936_v23  ;;  %v2572_v60 = vmul.f32 %v1568_v10, %v936_v23  ;;  %v1594_v14 = vld [vmem:[%s1722_s18 + $0xe8] sm:$0xff]  ;;  %v1595_v10 = vld [vmem:[%s1722_s18 + $0xf0] sm:$0xff] }
 0x16f   : > { %v931_v21 = vpop.permute.xlu0 %930  ;;  %v2575_v57 = vmul.f32 %v1569_v6, %v936_v23  ;;  %v2578_v8 = vmul.f32 %v1570_v20, %v936_v23  ;;  %v2581_v33 = vmul.f32 %v1571_v16, %v936_v23  ;;  %v1592_v23 = vld [vmem:[%s1722_s18 + $0xd8] sm:$0xff]  ;;  %v1597_v16 = vld [vmem:[%s1722_s18 + $0x100] sm:$0xff] }
 0x170   : > { %v2584_v12 = vmul.f32 %v1572_v9, %v931_v21  ;;  %v2587_v44 = vmul.f32 %v1573_v54, %v931_v21  ;;  %v2590_v58 = vmul.f32 %v1574_v51, %v931_v21  ;;  %v2593_v15 = vmul.f32 %v1575_v48, %v931_v21  ;;  %v1596_v20 = vld [vmem:[%s1722_s18 + $0xf8] sm:$0xff]  ;;  %v1598_v51 = vld [vmem:[%s1722_s18 + $0x108] sm:$0xff] }
 0x171   : > { %v2596_v13 = vmul.f32 %v1576_v47, %v931_v21  ;;  %v2599_v35 = vmul.f32 %v1577_v38, %v931_v21  ;;  %v2602_v1 = vmul.f32 %v1578_v19, %v931_v21  ;;  %v1593_v21 = vld [vmem:[%s1722_s18 + $0xe0] sm:$0xff]  ;;  %v1599_v47 = vld [vmem:[%s1722_s18 + $0x110] sm:$0xff]  ;;  %v1600_v19 = vld [vmem:[%s1722_s18 + $0x118] sm:$0xff] }
 0x173   : > { %v941_v25 = vpop.permute.xlu1 %940 }
 0x174   : > { %v2605_v5 = vmul.f32 %v1579_v62, %v941_v25  ;;  %v2608_v22 = vmul.f32 %v1580_v39, %v941_v25  ;;  %v2611_v63 = vmul.f32 %v1581_v11, %v941_v25  ;;  %v2616_v3 = vmul.f32 %v1582_v50, %v941_v25  ;;  %v1601_v39 = vld [vmem:[%s1722_s18 + $0x120] sm:$0xff]  ;;  %v1602_v50 = vld [vmem:[%s1722_s18 + $0x128] sm:$0xff] }
 0x175   : > { %v2619_v37 = vmul.f32 %v1583_v24, %v941_v25  ;;  %v2622_v46 = vmul.f32 %v1584_v28, %v941_v25  ;;  %v2625_v30 = vmul.f32 %v1585_v41, %v941_v25  ;;  %v1603_v28 = vld [vmem:[%s1722_s18 + $0x130] sm:$0xff]  ;;  %v1604_v41 = vld [vmem:[%s1722_s18 + $0x138] sm:$0xff] }
 0x177   : > { %v2552_v45 = vpop.permute.xlu1 %945 }
 0x178   : > { %v2629_v4 = vmul.f32 %v1586_v2, %v2552_v45  ;;  %v2633_v42 = vmul.f32 %v1587_v55, %v2552_v45  ;;  %v2637_v31 = vmul.f32 %v1588_v27, %v2552_v45  ;;  %v2641_v7 = vmul.f32 %v1589_v17, %v2552_v45  ;;  %v1605_v55 = vld [vmem:[%s1722_s18 + $0x140] sm:$0xff]  ;;  %v1606_v17 = vld [vmem:[%s1722_s18 + $0x148] sm:$0xff] }
 0x179   : > { %v2647_v34 = vmul.f32 %v1590_v59, %v2552_v45  ;;  %v2651_v53 = vmul.f32 %v1591_v26, %v2552_v45  ;;  %v2655_v25 = vmul.f32 %v1592_v23, %v2552_v45  ;;  %v1607_v26 = vld [vmem:[%s1722_s18 + $0x1f8] sm:$0xff] }
 0x17b   : > { %v2554_v52 = vpop.permute.xlu1 %950 }
 0x17c   : > { %v2659_v49 = vmul.f32 %v1593_v21, %v2554_v52  ;;  %v2663_v40 = vmul.f32 %v1594_v14, %v2554_v52  ;;  %v2667_v6 = vmul.f32 %v1595_v10, %v2554_v52  ;;  %v2671_v45 = vmul.f32 %v1596_v20, %v2554_v52  ;;  %v1608_v21 = vld [vmem:[%s1722_s18 + $0x200] sm:$0xff]  ;;  %v1609_v10 = vld [vmem:[%s1722_s18 + $0x208] sm:$0xff] }
 0x17d   : > { %v2675_v9 = vmul.f32 %v1597_v16, %v2554_v52  ;;  %v2681_v48 = vmul.f32 %v1598_v51, %v2554_v52  ;;  %v2685_v38 = vmul.f32 %v1599_v47, %v2554_v52  ;;  %v1610_v16 = vld [vmem:[%s1722_s18 + $0x210] sm:$0xff]  ;;  %v1611_v51 = vld [vmem:[%s1722_s18 + $0x218] sm:$0xff] }
 0x17f   : > { %v2556_v18 = vpop.permute.xlu1 %955  ;;  %v2561_v61 = vpop.permute.xlu0 %975 }
 0x180   : > { %v2689_v62 = vmul.f32 %v1600_v19, %v2556_v18  ;;  %v2693_v11 = vmul.f32 %v1601_v39, %v2556_v18  ;;  %v2697_v24 = vmul.f32 %v1602_v50, %v2556_v18  ;;  %v2701_v52 = vmul.f32 %v1603_v28, %v2556_v18  ;;  %v1612_v19 = vld [vmem:[%s1722_s18 + $0x220] sm:$0xff]  ;;  %v1613_v50 = vld [vmem:[%s1722_s18 + $0x228] sm:$0xff] }
 0x181   : > { %v2705_v2 = vmul.f32 %v1604_v41, %v2556_v18  ;;  %v2709_v27 = vmul.f32 %v1605_v55, %v2556_v18  ;;  %v2713_v59 = vmul.f32 %v1606_v17, %v2556_v18  ;;  %v2717_v23 = vmul.f32 %v1607_v26, %v2561_v61  ;;  %v1614_v17 = vld [vmem:[%s1722_s18 + $0x150] sm:$0xff] }
 0x182   : > { %v2721_v14 = vmul.f32 %v1608_v21, %v2561_v61  ;;  %v2725_v20 = vmul.f32 %v1609_v10, %v2561_v61  ;;  %v2729_v18 = vmul.f32 %v1610_v16, %v2561_v61  ;;  %v2733_v47 = vmul.f32 %v1611_v51, %v2561_v61  ;;  %v1615_v21 = vld [vmem:[%s1722_s18 + $0x158] sm:$0xff]  ;;  %v1616_v16 = vld [vmem:[%s1722_s18 + $0x160] sm:$0xff]  ;;  %v1617_v51 = vld [vmem:[%s1722_s18 + $0x168] sm:$0xff] }
 0x183   : > { %v2563_v32 = vpop.permute.xlu1 %960  ;;  %v2737_v39 = vmul.f32 %v1612_v19, %v2561_v61  ;;  %v2741_v28 = vmul.f32 %v1613_v50, %v2561_v61  ;;  %v1618_v50 = vld [vmem:[%s1722_s18 + $0x170] sm:$0xff] }
 0x184   : > { %3382 = vst [vmem:[#allocation2_spill] sm:$0xff] %v2721_v14  ;;  %3383 = vst [vmem:[#allocation6_spill] sm:$0xff] %v2725_v20  ;;  %v2749_v26 = vmul.f32 %v1614_v17, %v2563_v32  ;;  %v2753_v10 = vmul.f32 %v1615_v21, %v2563_v32  ;;  %v2757_v61 = vmul.f32 %v1616_v16, %v2563_v32  ;;  %v1642_v14 = vld [vmem:[%s1722_s18 + $0x2d8] sm:$0xff] }
 0x185   : > { %3384 = vst [vmem:[#allocation3_spill] sm:$0xff] %v2729_v18  ;;  %3385 = vst [vmem:[#allocation4_spill] sm:$0xff] %v2733_v47  ;;  %v2761_v19 = vmul.f32 %v1617_v51, %v2563_v32  ;;  %v2765_v17 = vmul.f32 %v1618_v50, %v2563_v32  ;;  %v1623_v50 = vld [vmem:[%s1722_s18 + $0x278] sm:$0xff]  ;;  %v1636_v47 = vld [vmem:[%s1722_s18 + $0x1c8] sm:$0xff] }
 0x186   : > { %v2643_v43 = vpop.permute.xlu0 %985  ;;  %3386 = vst [vmem:[#allocation5_spill] sm:$0xff] %v2737_v39  ;;  %3387 = vst [vmem:[#allocation7_spill] sm:$0xff] %v2741_v28  ;;  %v1635_v39 = vld [vmem:[%s1722_s18 + $0x1c0] sm:$0xff]  ;;  %v1637_v18 = vld [vmem:[%s1722_s18 + $0x1d0] sm:$0xff] }
 0x187   : > { %v2613_v29 = vpop.permute.xlu1 %965  ;;  %3388 = vst [vmem:[#allocation8_spill] sm:$0xff] %v2749_v26  ;;  %3389 = vst [vmem:[#allocation10_spill] sm:$0xff] %v2753_v10  ;;  %v1619_v26 = vld [vmem:[%s1722_s18 + $0x178] sm:$0xff]  ;;  %v1620_v10 = vld [vmem:[%s1722_s18 + $0x180] sm:$0xff] }
 0x188   : > { %3390 = vst [vmem:[#allocation9_spill] sm:$0xff] %v2757_v61  ;;  %3391 = vst [vmem:[#allocation11_spill] sm:$0xff] %v2761_v19  ;;  %v2769_v21 = vmul.f32 %v1619_v26, %v2563_v32  ;;  %v2773_v16 = vmul.f32 %v1620_v10, %v2563_v32  ;;  %v1621_v61 = vld [vmem:[%s1722_s18 + $0x268] sm:$0xff]  ;;  %v1622_v19 = vld [vmem:[%s1722_s18 + $0x270] sm:$0xff] }
 0x189   : > { %3392 = vst [vmem:[#allocation16_spill] sm:$0xff] %v2765_v17  ;;  %v2777_v51 = vmul.f32 %v1621_v61, %v2643_v43  ;;  %v2781_v28 = vmul.f32 %v1622_v19, %v2643_v43  ;;  %v2785_v17 = vmul.f32 %v1623_v50, %v2643_v43  ;;  %v1624_v26 = vld [vmem:[%s1722_s18 + $0x280] sm:$0xff]  ;;  %v1625_v32 = vld [vmem:[%s1722_s18 + $0x288] sm:$0xff]  ;;  %v1626_v61 = vld [vmem:[%s1722_s18 + $0x290] sm:$0xff] }
 0x18a   : > { %3393 = vst [vmem:[#allocation12_spill] sm:$0xff] %v2769_v21  ;;  %3394 = vst [vmem:[#allocation13_spill] sm:$0xff] %v2773_v16  ;;  %v2789_v21 = vmul.f32 %v1624_v26, %v2643_v43  ;;  %v2793_v10 = vmul.f32 %v1625_v32, %v2643_v43  ;;  %v2797_v19 = vmul.f32 %v1626_v61, %v2643_v43  ;;  %v1630_v61 = vld [vmem:[%s1722_s18 + $0x198] sm:$0xff] }
 0x18b   : > { %v2677_v54 = vpop.permute.xlu1 %970  ;;  %3395 = vst [vmem:[#allocation18_spill] sm:$0xff] %v2777_v51  ;;  %3396 = vst [vmem:[#allocation14_spill] sm:$0xff] %v2781_v28  ;;  %v1627_v28 = vld [vmem:[%s1722_s18 + $0x298] sm:$0xff] }
 0x18c   : > { %3397 = vst [vmem:[#allocation17_spill] sm:$0xff] %v2785_v17  ;;  %3398 = vst [vmem:[#allocation15_spill] sm:$0xff] %v2789_v21  ;;  %v2801_v50 = vmul.f32 %v1627_v28, %v2643_v43  ;;  %v1628_v17 = vld [vmem:[%s1722_s18 + $0x188] sm:$0xff]  ;;  %v1629_v21 = vld [vmem:[%s1722_s18 + $0x190] sm:$0xff] }
 0x18d   : > { %v2743_v41 = vpop.permute.xlu0 %995  ;;  %3399 = vst [vmem:[#allocation19_spill] sm:$0xff] %v2793_v10  ;;  %3400 = vst [vmem:[#allocation20_spill] sm:$0xff] %v2797_v19  ;;  %v2805_v26 = vmul.f32 %v1628_v17, %v2613_v29  ;;  %v2809_v32 = vmul.f32 %v1629_v21, %v2613_v29  ;;  %v2815_v19 = vmul.f32 %v1630_v61, %v2613_v29  ;;  %v1631_v43 = vld [vmem:[%s1722_s18 + $0x1a0] sm:$0xff]  ;;  %v1632_v17 = vld [vmem:[%s1722_s18 + $0x1a8] sm:$0xff] }
 0x18e   : > { %3401 = vst [vmem:[#allocation21_spill] sm:$0xff] %v2801_v50  ;;  %v2819_v28 = vmul.f32 %v1631_v43, %v2613_v29  ;;  %v2823_v50 = vmul.f32 %v1632_v17, %v2613_v29  ;;  %v1633_v21 = vld [vmem:[%s1722_s18 + $0x1b0] sm:$0xff]  ;;  %v1634_v16 = vld [vmem:[%s1722_s18 + $0x1b8] sm:$0xff]  ;;  %v2835_v43 = vmul.f32 %v1635_v39, %v2677_v54  ;;  %v2839_v17 = vmul.f32 %v1636_v47, %v2677_v54  ;;  %v1639_v39 = vld [vmem:[%s1722_s18 + $0x1e0] sm:$0xff] }
 0x18f   : > { %v2745_v55 = vpop.permute.xlu1 %980  ;;  %v2827_v51 = vmul.f32 %v1633_v21, %v2613_v29  ;;  %v2831_v61 = vmul.f32 %v1634_v16, %v2613_v29  ;;  %v2843_v21 = vmul.f32 %v1637_v18, %v2677_v54  ;;  %v1638_v29 = vld [vmem:[%s1722_s18 + $0x1d8] sm:$0xff]  ;;  %v1640_v47 = vld [vmem:[%s1722_s18 + $0x1e8] sm:$0xff]  ;;  %v1641_v18 = vld [vmem:[%s1722_s18 + $0x1f0] sm:$0xff] }
 0x190   : > { %3402 = vst [vmem:[#allocation22_spill] sm:$0xff] %v2835_v43  ;;  %3403 = vst [vmem:[#allocation23_spill] sm:$0xff] %v2839_v17  ;;  %v2849_v16 = vmul.f32 %v1638_v29, %v2677_v54  ;;  %v2853_v43 = vmul.f32 %v1639_v39, %v2677_v54  ;;  %v2857_v17 = vmul.f32 %v1640_v47, %v2677_v54 }
 0x191   : > { %3404 = vst [vmem:[#allocation24_spill] sm:$0xff] %v2843_v21  ;;  %v2861_v21 = vmul.f32 %v1641_v18, %v2677_v54  ;;  %v2865_v29 = vmul.f32 %v1642_v14, %v2743_v41  ;;  %v1646_v18 = vld [vmem:[%s1722_s18 + $0x2f8] sm:$0xff] }
 0x192   : > { %3405 = vst [vmem:[#allocation25_spill] sm:$0xff] %v2849_v16  ;;  %3406 = vst [vmem:[#allocation26_spill] sm:$0xff] %v2853_v43  ;;  %v1643_v16 = vld [vmem:[%s1722_s18 + $0x2e0] sm:$0xff]  ;;  %v1644_v43 = vld [vmem:[%s1722_s18 + $0x2e8] sm:$0xff]  ;;  %v2881_v14 = vmul.f32 %v1646_v18, %v2743_v41 }
 0x193   : > { %v2811_v10 = vpop.permute.xlu1 %990  ;;  %v2845_v20 = vpop.permute.xlu0 %1005  ;;  %3407 = vst [vmem:[#allocation27_spill] sm:$0xff] %v2857_v17  ;;  %3408 = vst [vmem:[#allocation28_spill] sm:$0xff] %v2861_v21  ;;  %v2869_v39 = vmul.f32 %v1643_v16, %v2743_v41  ;;  %v2873_v47 = vmul.f32 %v1644_v43, %v2743_v41  ;;  %v1645_v17 = vld [vmem:[%s1722_s18 + $0x2f0] sm:$0xff]  ;;  %v1648_v16 = vld [vmem:[%s1722_s18 + $0x308] sm:$0xff] }
 0x194   : > { %3409 = vst [vmem:[#allocation34_spill] sm:$0xff] %v2865_v29  ;;  %v2877_v54 = vmul.f32 %v1645_v17, %v2743_v41  ;;  %3412 = vst [vmem:[#allocation32_spill] sm:$0xff] %v2881_v14  ;;  %v1647_v29 = vld [vmem:[%s1722_s18 + $0x300] sm:$0xff]  ;;  %v1649_v43 = vld [vmem:[%s1722_s18 + $0x230] sm:$0xff] }
 0x195   : > { %3410 = vst [vmem:[#allocation29_spill] sm:$0xff] %v2869_v39  ;;  %3411 = vst [vmem:[#allocation31_spill] sm:$0xff] %v2873_v47  ;;  %v2885_v21 = vmul.f32 %v1647_v29, %v2743_v41  ;;  %v2889_v39 = vmul.f32 %v1648_v16, %v2743_v41  ;;  %v2893_v47 = vmul.f32 %v1649_v43, %v2745_v55  ;;  %v1650_v17 = vld [vmem:[%s1722_s18 + $0x238] sm:$0xff]  ;;  %v1651_v29 = vld [vmem:[%s1722_s18 + $0x240] sm:$0xff] }
 0x196   : > { %v2904_v18 = vmul.f32 %v1650_v17, %v2745_v55  ;;  %v1652_v41 = vld [vmem:[%s1722_s18 + $0x248] sm:$0xff]  ;;  %v1653_v43 = vld [vmem:[%s1722_s18 + $0x250] sm:$0xff] }
 0x197   : > { %3413 = vst [vmem:[#allocation30_spill] sm:$0xff] %v2885_v21  ;;  %3414 = vst [vmem:[#allocation33_spill] sm:$0xff] %v2889_v39  ;;  %v2908_v21 = vmul.f32 %v1651_v29, %v2745_v55  ;;  %v2912_v16 = vmul.f32 %v1652_v41, %v2745_v55  ;;  %v1128_v39 = vpop.permute.xlu0 %1127  ;;  %v2918_v17 = vpop.permute.xlu1 %1000 }
 0x198   : > { %3415 = vst [vmem:[#allocation35_spill] sm:$0xff] %v2893_v47  ;;  %3416 = vst [vmem:[#allocation36_spill] sm:$0xff] %v2904_v18  ;;  %v2916_v47 = vmul.f32 %v1653_v43, %v2745_v55  ;;  %v1207_v29 = vadd.f32 %v1128_v39, %v2559_v36  ;;  %v1209_v41 = vadd.f32 %v1128_v39, %v2569_v56  ;;  %v1654_v18 = vld [vmem:[%s1722_s18 + $0x258] sm:$0xff] }
 0x199   : > { %3417 = vst [vmem:[#allocation37_spill] sm:$0xff] %v2908_v21  ;;  %3418 = vst [vmem:[#allocation38_spill] sm:$0xff] %v2912_v16  ;;  %v1208_v21 = vadd.f32 %v1128_v39, %v2566_v0  ;;  %v1210_v16 = vadd.f32 %v1128_v39, %v2572_v60  ;;  %v2926_v43 = vmul.f32 %v1654_v18, %v2745_v55  ;;  %v1655_v0 = vld [vmem:[%s1722_s18 + $0x260] sm:$0xff] }
 0x19a   : > { %3419 = vst [vmem:[#allocation39_spill] sm:$0xff] %v2916_v47  ;;  %v1211_v47 = vadd.f32 %v1128_v39, %v2575_v57  ;;  %v1212_v14 = vadd.f32 %v1128_v39, %v2578_v8  ;;  %v1213_v36 = vadd.f32 %v1128_v39, %v2581_v33  ;;  %v2933_v56 = vmul.f32 %v1655_v0, %v2745_v55  ;;  %v1656_v60 = vld [vmem:[%s1722_s18 + $0x2a0] sm:$0xff]  ;;  %v1657_v8 = vld [vmem:[%s1722_s18 + $0x2a8] sm:$0xff]  ;;  %v1658_v33 = vld [vmem:[%s1722_s18 + $0x2b0] sm:$0xff] }
 0x19b   : > { %1319 = vst [vmem:[%s2900_s28 + $0x38] sm:$0xff] %v1207_v29  ;;  %1320 = vst [vmem:[%s2900_s28 + $0x40] sm:$0xff] %v1208_v21  ;;  %v2941_v57 = vmul.f32 %v1656_v60, %v2811_v10  ;;  %v2945_v18 = vmul.f32 %v1657_v8, %v2811_v10  ;;  %v2949_v39 = vmul.f32 %v1658_v33, %v2811_v10  ;;  %v1659_v55 = vld [vmem:[%s1722_s18 + $0x2b8] sm:$0xff]  ;;  %v1123_v60 = vpop.permute.xlu1 %1122 }
 0x19c   : > { %1321 = vst [vmem:[%s2900_s28 + $0x48] sm:$0xff] %v1209_v41  ;;  %1322 = vst [vmem:[%s2900_s28 + $0x50] sm:$0xff] %v1210_v16  ;;  %v2957_v21 = vmul.f32 %v1659_v55, %v2811_v10  ;;  %v1660_v16 = vld [vmem:[%s1722_s18 + $0x2c0] sm:$0xff]  ;;  %v1661_v41 = vld [vmem:[%s1722_s18 + $0x2c8] sm:$0xff] }
 0x19d   : > { %1323 = vst [vmem:[%s2900_s28 + $0x58] sm:$0xff] %v1211_v47  ;;  %1324 = vst [vmem:[%s2900_s28 + $0x60] sm:$0xff] %v1212_v14  ;;  %v2961_v29 = vmul.f32 %v1660_v16, %v2811_v10  ;;  %v2965_v0 = vmul.f32 %v1661_v41, %v2811_v10  ;;  %v1662_v47 = vld [vmem:[%s1722_s18 + $0x2d0] sm:$0xff] }
 0x19e   : > { %1325 = vst.msk [vmem:[%s2900_s28 + $0x68] sm:$0xff] %vm340_vm0, %v1213_v36  ;;  %v2969_v14 = vmul.f32 %v1662_v47, %v2811_v10  ;;  %v1138_v36 = vpop.permute.xlu0 %1137  ;;  %v1200_v47 = vadd.f32 %v1123_v60, %v2584_v12 }
 0x19f   : > { %3420 = vst [vmem:[#allocation40_spill] sm:$0xff] %v2965_v0  ;;  %v1221_v8 = vadd.f32 %v1138_v36, %v2629_v4  ;;  %v1222_v33 = vadd.f32 %v1138_v36, %v2633_v42  ;;  %v1223_v55 = vadd.f32 %v1138_v36, %v2637_v31  ;;  %v1224_v16 = vadd.f32 %v1138_v36, %v2641_v7 }
 0x1a0   : > { %v1225_v41 = vadd.f32 %v1138_v36, %v2647_v34  ;;  %v1226_v0 = vadd.f32 %v1138_v36, %v2651_v53  ;;  %v1227_v10 = vadd.f32 %v1138_v36, %v2655_v25  ;;  %v1201_v4 = vadd.f32 %v1123_v60, %v2587_v44  ;;  %1312 = vst [vmem:[%s2900_s28] sm:$0xff] %v1200_v47  ;;  %v1133_v44 = vpop.permute.xlu1 %1132 }
 0x1a1   : > { %1333 = vst [vmem:[%s2900_s28 + $0xa8] sm:$0xff] %v1221_v8  ;;  %1334 = vst [vmem:[%s2900_s28 + $0xb0] sm:$0xff] %v1222_v33  ;;  %v1202_v42 = vadd.f32 %v1123_v60, %v2590_v58  ;;  %v1203_v31 = vadd.f32 %v1123_v60, %v2593_v15  ;;  %v1204_v7 = vadd.f32 %v1123_v60, %v2596_v13  ;;  %v1663_v58 = vld [vmem:[%s1722_s18 + $0x348] sm:$0xff]  ;;  %v1664_v13 = vld [vmem:[%s1722_s18 + $0x350] sm:$0xff] }
 0x1a2   : > { %1335 = vst [vmem:[%s2900_s28 + $0xb8] sm:$0xff] %v1223_v55  ;;  %1336 = vst [vmem:[%s2900_s28 + $0xc0] sm:$0xff] %v1224_v16  ;;  %v1148_v12 = vpop.permute.xlu0 %1147  ;;  %v1205_v34 = vadd.f32 %v1123_v60, %v2599_v35  ;;  %v1206_v53 = vadd.f32 %v1123_v60, %v2602_v1  ;;  %v2996_v15 = vmul.f32 %v1663_v58, %v2845_v20 }
 0x1a3   : > { %1337 = vst [vmem:[%s2900_s28 + $0xc8] sm:$0xff] %v1225_v41  ;;  %1338 = vst [vmem:[%s2900_s28 + $0xd0] sm:$0xff] %v1226_v0  ;;  %v3000_v25 = vmul.f32 %v1664_v13, %v2845_v20  ;;  %v1235_v0 = vadd.f32 %v1148_v12, %v2689_v62  ;;  %v1236_v35 = vadd.f32 %v1148_v12, %v2693_v11  ;;  %v3425_v13 = vld [vmem:[#allocation5_spill] sm:$0xff] }
 0x1a4   : > { %1339 = vst.msk [vmem:[%s2900_s28 + $0xd8] sm:$0xff] %vm340_vm0, %v1227_v10  ;;  %v1237_v1 = vadd.f32 %v1148_v12, %v2697_v24  ;;  %v1238_v36 = vadd.f32 %v1148_v12, %v2701_v52  ;;  %1313 = vst [vmem:[%s2900_s28 + $0x8] sm:$0xff] %v1201_v4  ;;  %v1239_v60 = vadd.f32 %v1148_v12, %v2705_v2 }
 0x1a5   : > { %1314 = vst [vmem:[%s2900_s28 + $0x10] sm:$0xff] %v1202_v42  ;;  %1315 = vst [vmem:[%s2900_s28 + $0x18] sm:$0xff] %v1203_v31  ;;  %v1240_v8 = vadd.f32 %v1148_v12, %v2709_v27  ;;  %v1241_v62 = vadd.f32 %v1148_v12, %v2713_v59  ;;  %v1214_v11 = vadd.f32 %v1133_v44, %v2605_v5 }
 0x1a6   : > { %1316 = vst [vmem:[%s2900_s28 + $0x20] sm:$0xff] %v1204_v7  ;;  %1317 = vst [vmem:[%s2900_s28 + $0x28] sm:$0xff] %v1205_v34  ;;  %v1215_v24 = vadd.f32 %v1133_v44, %v2608_v22  ;;  %v1216_v52 = vadd.f32 %v1133_v44, %v2611_v63  ;;  %v1217_v2 = vadd.f32 %v1133_v44, %v2616_v3  ;;  %v1158_v5 = vpop.permute.xlu0 %1157  ;;  %v1143_v22 = vpop.permute.xlu1 %1142  ;;  %v1665_v63 = vld [vmem:[%s1722_s18 + $0x358] sm:$0xff]  ;;  %v3421_v7 = vld [vmem:[#allocation2_spill] sm:$0xff] }
 0x1a7   : > { %1318 = vst.msk [vmem:[%s2900_s28 + $0x30] sm:$0xff] %vm340_vm0, %v1206_v53  ;;  %1347 = vst [vmem:[%s2900_s28 + $0x118] sm:$0xff] %v1235_v0  ;;  %v1218_v27 = vadd.f32 %v1133_v44, %v2619_v37  ;;  %v1219_v59 = vadd.f32 %v1133_v44, %v2622_v46  ;;  %v1220_v33 = vadd.f32 %v1133_v44, %v2625_v30  ;;  %v1666_v37 = vld [vmem:[%s1722_s18 + $0x360] sm:$0xff]  ;;  %v3423_v34 = vld [vmem:[#allocation3_spill] sm:$0xff] }
 0x1a8   : > { %1348 = vst [vmem:[%s2900_s28 + $0x120] sm:$0xff] %v1236_v35  ;;  %1349 = vst [vmem:[%s2900_s28 + $0x128] sm:$0xff] %v1237_v1  ;;  %v3034_v3 = vmul.f32 %v1665_v63, %v2845_v20  ;;  %v3038_v55 = vmul.f32 %v1666_v37, %v2845_v20  ;;  %v1249_v16 = vadd.f32 %v1158_v5, %v2805_v26  ;;  %v3424_v44 = vld [vmem:[#allocation4_spill] sm:$0xff] }
 0x1a9   : > { %1350 = vst [vmem:[%s2900_s28 + $0x130] sm:$0xff] %v1238_v36  ;;  %1351 = vst [vmem:[%s2900_s28 + $0x138] sm:$0xff] %v1239_v60  ;;  %v1250_v46 = vadd.f32 %v1158_v5, %v2809_v32  ;;  %v1251_v30 = vadd.f32 %v1158_v5, %v2815_v19  ;;  %v1252_v41 = vadd.f32 %v1158_v5, %v2819_v28  ;;  %v3427_v1 = vld [vmem:[#allocation8_spill] sm:$0xff]  ;;  %v3428_v60 = vld [vmem:[#allocation10_spill] sm:$0xff] }
 0x1aa   : > { %1352 = vst [vmem:[%s2900_s28 + $0x140] sm:$0xff] %v1240_v8  ;;  %1353 = vst.msk [vmem:[%s2900_s28 + $0x148] sm:$0xff] %vm340_vm0, %v1241_v62  ;;  %v1253_v10 = vadd.f32 %v1158_v5, %v2823_v50  ;;  %v1254_v47 = vadd.f32 %v1158_v5, %v2827_v51  ;;  %v1255_v26 = vadd.f32 %v1158_v5, %v2831_v61  ;;  %v3429_v62 = vld [vmem:[#allocation9_spill] sm:$0xff] }
 0x1ab   : > { %1326 = vst [vmem:[%s2900_s28 + $0x70] sm:$0xff] %v1214_v11  ;;  %1327 = vst [vmem:[%s2900_s28 + $0x78] sm:$0xff] %v1215_v24  ;;  %v1228_v19 = vadd.f32 %v1143_v22, %v2659_v49  ;;  %v1229_v32 = vadd.f32 %v1143_v22, %v2663_v40  ;;  %v1230_v50 = vadd.f32 %v1143_v22, %v2667_v6  ;;  %v1168_v49 = vpop.permute.xlu0 %1167  ;;  %v1153_v40 = vpop.permute.xlu1 %1152  ;;  %v1667_v6 = vld [vmem:[%s1722_s18 + $0x368] sm:$0xff] }
 0x1ac   : > { %1328 = vst [vmem:[%s2900_s28 + $0x80] sm:$0xff] %v1216_v52  ;;  %1329 = vst [vmem:[%s2900_s28 + $0x88] sm:$0xff] %v1217_v2  ;;  %v1231_v51 = vadd.f32 %v1143_v22, %v2671_v45  ;;  %v1232_v28 = vadd.f32 %v1143_v22, %v2675_v9  ;;  %v1233_v61 = vadd.f32 %v1143_v22, %v2681_v48  ;;  %v1668_v9 = vld [vmem:[%s1722_s18 + $0x370] sm:$0xff]  ;;  %v3430_v24 = vld [vmem:[#allocation11_spill] sm:$0xff] }
 0x1ad   : > { %1330 = vst [vmem:[%s2900_s28 + $0x90] sm:$0xff] %v1218_v27  ;;  %1331 = vst [vmem:[%s2900_s28 + $0x98] sm:$0xff] %v1219_v59  ;;  %v1234_v4 = vadd.f32 %v1143_v22, %v2685_v38  ;;  %v3072_v45 = vmul.f32 %v1667_v6, %v2845_v20  ;;  %v3076_v42 = vmul.f32 %v1668_v9, %v2845_v20  ;;  %v3422_v38 = vld [vmem:[#allocation6_spill] sm:$0xff]  ;;  %v3431_v2 = vld [vmem:[#allocation16_spill] sm:$0xff] }
 0x1ae   : > { %1332 = vst.msk [vmem:[%s2900_s28 + $0xa0] sm:$0xff] %vm340_vm0, %v1220_v33  ;;  %1361 = vst [vmem:[%s2900_s28 + $0x188] sm:$0xff] %v1249_v16  ;;  %v1263_v31 = vadd.f32 %v1168_v49, %v2717_v23  ;;  %v1264_v48 = vadd.f32 %v1168_v49, %v3421_v7  ;;  %v1265_v12 = vadd.f32 %v1168_v49, %v3422_v38  ;;  %v3426_v23 = vld [vmem:[#allocation7_spill] sm:$0xff]  ;;  %v3432_v59 = vld [vmem:[#allocation12_spill] sm:$0xff] }
 0x1af   : > { %1362 = vst [vmem:[%s2900_s28 + $0x190] sm:$0xff] %v1250_v46  ;;  %1363 = vst [vmem:[%s2900_s28 + $0x198] sm:$0xff] %v1251_v30  ;;  %v1266_v53 = vadd.f32 %v1168_v49, %v3423_v34  ;;  %v1267_v58 = vadd.f32 %v1168_v49, %v3424_v44  ;;  %v1268_v0 = vadd.f32 %v1168_v49, %v3425_v13  ;;  %v1178_v5 = vpop.permute.xlu0 %1177  ;;  %v3433_v22 = vld [vmem:[#allocation13_spill] sm:$0xff]  ;;  %v1163_v37 = vpop.permute.xlu1 %1162  ;;  %v1670_v30 = vld [vmem:[%s1722_s18 + $0x310] sm:$0xff] }
 0x1b0   : > { %1364 = vst [vmem:[%s2900_s28 + $0x1a0] sm:$0xff] %v1252_v41  ;;  %1365 = vst [vmem:[%s2900_s28 + $0x1a8] sm:$0xff] %v1253_v10  ;;  %v1269_v35 = vadd.f32 %v1168_v49, %v3426_v23  ;;  %v1242_v36 = vadd.f32 %v1153_v40, %v3427_v1  ;;  %v1243_v8 = vadd.f32 %v1153_v40, %v3428_v60  ;;  %v1669_v16 = vld [vmem:[%s1722_s18 + $0x378] sm:$0xff]  ;;  %v3434_v10 = vld [vmem:[#allocation18_spill] sm:$0xff] }
 0x1b1   : > { %1366 = vst [vmem:[%s2900_s28 + $0x1b0] sm:$0xff] %v1254_v47  ;;  %1367 = vst.msk [vmem:[%s2900_s28 + $0x1b8] sm:$0xff] %vm340_vm0, %v1255_v26  ;;  %v1244_v11 = vadd.f32 %v1153_v40, %v3429_v62  ;;  %v1245_v52 = vadd.f32 %v1153_v40, %v3430_v24  ;;  %v1246_v27 = vadd.f32 %v1153_v40, %v3431_v2  ;;  %v3435_v26 = vld [vmem:[#allocation14_spill] sm:$0xff]  ;;  %v3442_v7 = vld [vmem:[#allocation23_spill] sm:$0xff] }
 0x1b2   : > { %1340 = vst [vmem:[%s2900_s28 + $0xe0] sm:$0xff] %v1228_v19  ;;  %1341 = vst [vmem:[%s2900_s28 + $0xe8] sm:$0xff] %v1229_v32  ;;  %v1247_v33 = vadd.f32 %v1153_v40, %v3432_v59  ;;  %v1248_v63 = vadd.f32 %v1153_v40, %v3433_v22  ;;  %v3110_v46 = vmul.f32 %v1669_v16, %v2845_v20  ;;  %v3436_v32 = vld [vmem:[#allocation17_spill] sm:$0xff]  ;;  %v3438_v20 = vld [vmem:[#allocation19_spill] sm:$0xff] }
 0x1b3   : > { %1342 = vst [vmem:[%s2900_s28 + $0xf0] sm:$0xff] %v1230_v50  ;;  %1343 = vst [vmem:[%s2900_s28 + $0xf8] sm:$0xff] %v1231_v51  ;;  %v3114_v41 = vmul.f32 %v1670_v30, %v2918_v17  ;;  %v1277_v47 = vadd.f32 %v1178_v5, %v3434_v10  ;;  %v1278_v19 = vadd.f32 %v1178_v5, %v3435_v26  ;;  %v3437_v51 = vld [vmem:[#allocation15_spill] sm:$0xff]  ;;  %v3440_v40 = vld [vmem:[#allocation21_spill] sm:$0xff]  ;;  %v1188_v13 = vpop.permute.xlu0 %1187 }
 0x1b4   : > { %1344 = vst [vmem:[%s2900_s28 + $0x100] sm:$0xff] %v1232_v28  ;;  %1345 = vst [vmem:[%s2900_s28 + $0x108] sm:$0xff] %v1233_v61  ;;  %v1279_v50 = vadd.f32 %v1178_v5, %v3436_v32  ;;  %v1280_v28 = vadd.f32 %v1178_v5, %v3437_v51  ;;  %v1281_v49 = vadd.f32 %v1178_v5, %v3438_v20  ;;  %v3439_v61 = vld [vmem:[#allocation20_spill] sm:$0xff]  ;;  %v3441_v9 = vld [vmem:[#allocation22_spill] sm:$0xff] }
 0x1b5   : > { %1346 = vst.msk [vmem:[%s2900_s28 + $0x110] sm:$0xff] %vm340_vm0, %v1234_v4  ;;  %1375 = vst [vmem:[%s2900_s28 + $0x1f8] sm:$0xff] %v1263_v31  ;;  %v1282_v4 = vadd.f32 %v1178_v5, %v3439_v61  ;;  %v1283_v6 = vadd.f32 %v1178_v5, %v3440_v40  ;;  %v1256_v31 = vadd.f32 %v1163_v37, %v3441_v9  ;;  %v3443_v38 = vld [vmem:[#allocation24_spill] sm:$0xff]  ;;  %v3444_v34 = vld [vmem:[#allocation25_spill] sm:$0xff] }
 0x1b6   : > { %1376 = vst [vmem:[%s2900_s28 + $0x200] sm:$0xff] %v1264_v48  ;;  %1377 = vst [vmem:[%s2900_s28 + $0x208] sm:$0xff] %v1265_v12  ;;  %v1257_v48 = vadd.f32 %v1163_v37, %v3442_v7  ;;  %v1258_v12 = vadd.f32 %v1163_v37, %v3443_v38  ;;  %v3445_v44 = vld [vmem:[#allocation26_spill] sm:$0xff]  ;;  %v1671_v60 = vld [vmem:[%s1722_s18 + $0x318] sm:$0xff] }
 0x1b7   : > { %1378 = vst [vmem:[%s2900_s28 + $0x210] sm:$0xff] %v1266_v53  ;;  %1379 = vst [vmem:[%s2900_s28 + $0x218] sm:$0xff] %v1267_v58  ;;  %v1259_v53 = vadd.f32 %v1163_v37, %v3444_v34  ;;  %v1260_v58 = vadd.f32 %v1163_v37, %v3445_v44  ;;  %v1672_v62 = vld [vmem:[%s1722_s18 + $0x320] sm:$0xff]  ;;  %v3449_v2 = vld [vmem:[#allocation29_spill] sm:$0xff]  ;;  %v1198_v61 = vpop.permute.xlu0 %1197 }
 0x1b8   : > { %1380 = vst [vmem:[%s2900_s28 + $0x220] sm:$0xff] %v1268_v0  ;;  %1381 = vst.msk [vmem:[%s2900_s28 + $0x228] sm:$0xff] %vm340_vm0, %v1269_v35  ;;  %v3446_v0 = vld [vmem:[#allocation27_spill] sm:$0xff]  ;;  %v3447_v35 = vld [vmem:[#allocation28_spill] sm:$0xff]  ;;  %v1305_v38 = vadd.f32 %v1198_v61, %v2996_v15  ;;  %v1309_v34 = vadd.f32 %v1198_v61, %v3072_v45  ;;  %v1311_v15 = vadd.f32 %v1198_v61, %v3110_v46 }
 0x1b9   : > { %1354 = vst [vmem:[%s2900_s28 + $0x150] sm:$0xff] %v1242_v36  ;;  %1355 = vst [vmem:[%s2900_s28 + $0x158] sm:$0xff] %v1243_v8  ;;  %v1261_v23 = vadd.f32 %v1163_v37, %v3446_v0  ;;  %v1262_v1 = vadd.f32 %v1163_v37, %v3447_v35  ;;  %v1173_v36 = vpop.permute.xlu1 %1172  ;;  %v3148_v8 = vmul.f32 %v1671_v60, %v2918_v17  ;;  %v3448_v24 = vld [vmem:[#allocation34_spill] sm:$0xff]  ;;  %v3450_v5 = vld [vmem:[#allocation31_spill] sm:$0xff] }
 0x1ba   : > { %1356 = vst [vmem:[%s2900_s28 + $0x160] sm:$0xff] %v1244_v11  ;;  %1357 = vst [vmem:[%s2900_s28 + $0x168] sm:$0xff] %v1245_v52  ;;  %v3152_v11 = vmul.f32 %v1672_v62, %v2918_v17  ;;  %v1291_v52 = vadd.f32 %v1188_v13, %v3448_v24  ;;  %v1293_v59 = vadd.f32 %v1188_v13, %v3450_v5  ;;  %v3451_v22 = vld [vmem:[#allocation32_spill] sm:$0xff]  ;;  %v3452_v37 = vld [vmem:[#allocation30_spill] sm:$0xff] }
 0x1bb   : > { %1358 = vst [vmem:[%s2900_s28 + $0x170] sm:$0xff] %v1246_v27  ;;  %1359 = vst [vmem:[%s2900_s28 + $0x178] sm:$0xff] %v1247_v33  ;;  %v1292_v27 = vadd.f32 %v1188_v13, %v3449_v2  ;;  %v1294_v33 = vadd.f32 %v1188_v13, %v2877_v54  ;;  %v1296_v16 = vadd.f32 %v1188_v13, %v3452_v37  ;;  %v3453_v30 = vld [vmem:[#allocation33_spill] sm:$0xff]  ;;  %v3455_v54 = vld [vmem:[#allocation36_spill] sm:$0xff] }
 0x1bc   : > { %1360 = vst.msk [vmem:[%s2900_s28 + $0x180] sm:$0xff] %vm340_vm0, %v1248_v63  ;;  %1389 = vst [vmem:[%s2900_s28 + $0x268] sm:$0xff] %v1277_v47  ;;  %v1295_v63 = vadd.f32 %v1188_v13, %v3451_v22  ;;  %v1297_v10 = vadd.f32 %v1188_v13, %v3453_v30  ;;  %v3454_v47 = vld [vmem:[#allocation35_spill] sm:$0xff]  ;;  %v3456_v32 = vld [vmem:[#allocation37_spill] sm:$0xff]  ;;  %v1276_v40 = vadd.f32 %v1173_v36, %v2933_v56 }
 0x1bd   : > { %1390 = vst [vmem:[%s2900_s28 + $0x270] sm:$0xff] %v1278_v19  ;;  %1391 = vst [vmem:[%s2900_s28 + $0x278] sm:$0xff] %v1279_v50  ;;  %v1270_v26 = vadd.f32 %v1173_v36, %v3454_v47  ;;  %v1271_v19 = vadd.f32 %v1173_v36, %v3455_v54  ;;  %v1272_v50 = vadd.f32 %v1173_v36, %v3456_v32  ;;  %v3457_v51 = vld [vmem:[#allocation38_spill] sm:$0xff]  ;;  %v3458_v20 = vld [vmem:[#allocation39_spill] sm:$0xff] }
 0x1be   : > { %1392 = vst [vmem:[%s2900_s28 + $0x280] sm:$0xff] %v1280_v28  ;;  %1393 = vst [vmem:[%s2900_s28 + $0x288] sm:$0xff] %v1281_v49  ;;  %v1273_v28 = vadd.f32 %v1173_v36, %v3457_v51  ;;  %v1274_v49 = vadd.f32 %v1173_v36, %v3458_v20  ;;  %v1673_v9 = vld [vmem:[%s1722_s18 + $0x328] sm:$0xff]  ;;  %v1674_v7 = vld [vmem:[%s1722_s18 + $0x330] sm:$0xff]  ;;  %v1308_v56 = vadd.f32 %v1198_v61, %v3038_v55 }
 0x1bf   : > { %1394 = vst [vmem:[%s2900_s28 + $0x290] sm:$0xff] %v1282_v4  ;;  %1395 = vst.msk [vmem:[%s2900_s28 + $0x298] sm:$0xff] %vm340_vm0, %v1283_v6  ;;  %v1275_v4 = vadd.f32 %v1173_v36, %v2926_v43  ;;  %v1183_v6 = vpop.permute.xlu1 %1182  ;;  %v1307_v43 = vadd.f32 %v1198_v61, %v3034_v3 }
 0x1c0   : > { %1368 = vst [vmem:[%s2900_s28 + $0x1c0] sm:$0xff] %v1256_v31  ;;  %1369 = vst [vmem:[%s2900_s28 + $0x1c8] sm:$0xff] %v1257_v48  ;;  %v1109_v31 = vmul.f32 %v1673_v9, %v2918_v17  ;;  %v1110_v48 = vmul.f32 %v1674_v7, %v2918_v17  ;;  %v1285_v3 = vadd.f32 %v1183_v6, %v2945_v18  ;;  %v1675_v18 = vld [vmem:[%s1722_s18 + $0x338] sm:$0xff] }
 0x1c1   : > { %1370 = vst [vmem:[%s2900_s28 + $0x1d0] sm:$0xff] %v1258_v12  ;;  %1371 = vst [vmem:[%s2900_s28 + $0x1d8] sm:$0xff] %v1259_v53  ;;  %v1306_v12 = vadd.f32 %v1198_v61, %v3000_v25  ;;  %v1310_v53 = vadd.f32 %v1198_v61, %v3076_v42  ;;  %v1284_v25 = vadd.f32 %v1183_v6, %v2941_v57  ;;  %v3459_v57 = vld [vmem:[#allocation40_spill] sm:$0xff] }
 0x1c2   : > { %1372 = vst [vmem:[%s2900_s28 + $0x1e0] sm:$0xff] %v1260_v58  ;;  %1373 = vst [vmem:[%s2900_s28 + $0x1e8] sm:$0xff] %v1261_v23  ;;  %v1286_v55 = vadd.f32 %v1183_v6, %v2949_v39  ;;  %v1287_v45 = vadd.f32 %v1183_v6, %v2957_v21  ;;  %v1288_v42 = vadd.f32 %v1183_v6, %v2961_v29  ;;  %v1676_v58 = vld [vmem:[%s1722_s18 + $0x340] sm:$0xff] }
 0x1c3   : > { %1374 = vst.msk [vmem:[%s2900_s28 + $0x1f0] sm:$0xff] %vm340_vm0, %v1262_v1  ;;  %1403 = vst [vmem:[%s2900_s28 + $0x2d8] sm:$0xff] %v1291_v52  ;;  %v1289_v46 = vadd.f32 %v1183_v6, %v3459_v57  ;;  %v1290_v44 = vadd.f32 %v1183_v6, %v2969_v14  ;;  %v1111_v39 = vmul.f32 %v1675_v18, %v2918_v17  ;;  %v1193_v29 = vpop.permute.xlu1 %1192 }
 0x1c4   : > { %1404 = vst [vmem:[%s2900_s28 + $0x2e0] sm:$0xff] %v1292_v27  ;;  %1405 = vst [vmem:[%s2900_s28 + $0x2e8] sm:$0xff] %v1293_v59  ;;  %v1112_v21 = vmul.f32 %v1676_v58, %v2918_v17  ;;  %v1298_v14 = vadd.f32 %v1193_v29, %v3114_v41  ;;  %v1299_v13 = vadd.f32 %v1193_v29, %v3148_v8 }
 0x1c5   : > { %1406 = vst [vmem:[%s2900_s28 + $0x2f0] sm:$0xff] %v1294_v33  ;;  %1407 = vst [vmem:[%s2900_s28 + $0x2f8] sm:$0xff] %v1295_v63  ;;  %v1300_v0 = vadd.f32 %v1193_v29, %v3152_v11  ;;  %v1301_v23 = vadd.f32 %v1193_v29, %v1109_v31  ;;  %v1302_v17 = vadd.f32 %v1193_v29, %v1110_v48 }
 0x1c6   : > { %1408 = vst [vmem:[%s2900_s28 + $0x300] sm:$0xff] %v1296_v16  ;;  %1409 = vst.msk [vmem:[%s2900_s28 + $0x308] sm:$0xff] %vm340_vm0, %v1297_v10  ;;  %v1303_v35 = vadd.f32 %v1193_v29, %v1111_v39  ;;  %v1304_v1 = vadd.f32 %v1193_v29, %v1112_v21 }
 0x1c7   : > { %1382 = vst [vmem:[%s2900_s28 + $0x230] sm:$0xff] %v1270_v26  ;;  %1383 = vst [vmem:[%s2900_s28 + $0x238] sm:$0xff] %v1271_v19 }
 0x1c8   : > { %1384 = vst [vmem:[%s2900_s28 + $0x240] sm:$0xff] %v1272_v50  ;;  %1385 = vst [vmem:[%s2900_s28 + $0x248] sm:$0xff] %v1273_v28 }
 0x1c9   : > { %1386 = vst [vmem:[%s2900_s28 + $0x250] sm:$0xff] %v1274_v49  ;;  %1387 = vst [vmem:[%s2900_s28 + $0x258] sm:$0xff] %v1275_v4 }
 0x1ca   : > { %1388 = vst.msk [vmem:[%s2900_s28 + $0x260] sm:$0xff] %vm340_vm0, %v1276_v40  ;;  %1417 = vst [vmem:[%s2900_s28 + $0x348] sm:$0xff] %v1305_v38 }
 0x1cb   : > { %1418 = vst [vmem:[%s2900_s28 + $0x350] sm:$0xff] %v1306_v12  ;;  %1419 = vst [vmem:[%s2900_s28 + $0x358] sm:$0xff] %v1307_v43 }
 0x1cc   : > { %1420 = vst [vmem:[%s2900_s28 + $0x360] sm:$0xff] %v1308_v56  ;;  %1421 = vst [vmem:[%s2900_s28 + $0x368] sm:$0xff] %v1309_v34 }
 0x1cd   : > { %1422 = vst [vmem:[%s2900_s28 + $0x370] sm:$0xff] %v1310_v53  ;;  %1423 = vst.msk [vmem:[%s2900_s28 + $0x378] sm:$0xff] %vm340_vm0, %v1311_v15 }
 0x1ce   : > { %1396 = vst [vmem:[%s2900_s28 + $0x2a0] sm:$0xff] %v1284_v25  ;;  %1397 = vst [vmem:[%s2900_s28 + $0x2a8] sm:$0xff] %v1285_v3 }
 0x1cf   : > { %1398 = vst [vmem:[%s2900_s28 + $0x2b0] sm:$0xff] %v1286_v55  ;;  %1399 = vst [vmem:[%s2900_s28 + $0x2b8] sm:$0xff] %v1287_v45 }
 0x1d0   : > { %1400 = vst [vmem:[%s2900_s28 + $0x2c0] sm:$0xff] %v1288_v42  ;;  %1401 = vst [vmem:[%s2900_s28 + $0x2c8] sm:$0xff] %v1289_v46 }
 0x1d1   : > { %1402 = vst.msk [vmem:[%s2900_s28 + $0x2d0] sm:$0xff] %vm340_vm0, %v1290_v44  ;;  %1410 = vst [vmem:[%s2900_s28 + $0x310] sm:$0xff] %v1298_v14 }
 0x1d2   : > { %1411 = vst [vmem:[%s2900_s28 + $0x318] sm:$0xff] %v1299_v13  ;;  %1412 = vst [vmem:[%s2900_s28 + $0x320] sm:$0xff] %v1300_v0 }
 0x1d3   : > { %1413 = vst [vmem:[%s2900_s28 + $0x328] sm:$0xff] %v1301_v23  ;;  %1414 = vst [vmem:[%s2900_s28 + $0x330] sm:$0xff] %v1302_v17 }
 0x1d4   : > { %1415 = vst [vmem:[%s2900_s28 + $0x338] sm:$0xff] %v1303_v35  ;;  %1416 = vst.msk [vmem:[%s2900_s28 + $0x340] sm:$0xff] %vm340_vm0, %v1304_v1 }
 0x1d5 PF: > { %s13_s12 = sadd.s32 1, %s1683_s12  }
 0x1d6   : > { %p10_p4 = scmp.ge.s32.totalorder %s13_s12, 4  }
 0x1d8   :  { %12 = sbr.rel (!%p10_p4) target bundleno = 1 (0x1), region = 68 }

</bundles_post_ra>
